<compile_context>
chip_gen: v6e
topology: v6e:2x2x1
jax: 0.10.0
libtpu: 0.0.40
codegen_flags: <defaults>
</compile_context>

<pallas_src>
import functools

import jax
import jax.numpy as jnp
from jax.experimental import pallas as pl
from jax.experimental.pallas import tpu as pltpu


def _resblock_kernel(x_ref, w1_ref, b1_ref, w2_ref, b2_ref, o_ref, f_ref, *, H, W):
    """One image per grid step.

    x_ref  : (1, C, H*W)     channels on sublanes, flat spatial on lanes
    w*_ref : (Cout, 9*Cin)   im2col weight matrix, f32 (prepared in wrapper)
    b*_ref : (Cout, 1)       f32
    o_ref  : (1, Cout, H*W)
    f_ref  : (Cin, Lflat)    flat zero-padded image scratch, Lflat=(H+2)*(W+2)+2
    """
    C = x_ref.shape[1]
    Wp = W + 2                      # padded width
    HWp = H * Wp                    # length of the width-padded output grid
    Lflat = f_ref.shape[1]

    # --- re-establish the tiny pad border each step (38 lanes, NOT a full
    #     memset; the per-row writes below cover everything else).  Doing this
    #     unconditionally keeps the kernel correct under megacore sharding of
    #     the "parallel" batch axis (per-core scratch, no program_id==0 init).
    f_ref[:, 0:Wp] = jnp.zeros((C, Wp), jnp.float32)                  # top pad row
    f_ref[:, (H + 1) * Wp:] = jnp.zeros((C, Lflat - (H + 1) * Wp),    # bottom row + tail
                                        jnp.float32)

    zcol = jnp.zeros((C, 1), jnp.float32)

    def write_padded_rows(v, row_stride):
        # Scatter image rows (with their 1-px zero side pads) into the flat
        # scratch: padded pixel (r, c) lives at lane r*Wp + c.
        for y in range(H):
            row = v[:, y * row_stride:y * row_stride + W]             # (C, W)
            f_ref[:, (y + 1) * Wp:(y + 2) * Wp] = jnp.concatenate(
                [zcol, row, zcol], axis=-1)

    def conv3x3(w_mat, b_col):
        # im2col along K: the 9 taps are constant-lane-offset views of the flat
        # padded image (XLU lane shifts, stride-preserving), stacked on the
        # contraction axis -> ONE (Cout, 9C) @ (9C, H*Wp) MXU matmul; bias
        # added once.  Output is on the width-padded grid (lane q = y*Wp + x).
        f = f_ref[...]                                                # (C, Lflat)
        slabs = [f[:, kh * Wp + kw: kh * Wp + kw + HWp]
                 for kh in range(3) for kw in range(3)]
        patches = jnp.concatenate(slabs, axis=0)                      # (9C, HWp)
        return jnp.dot(w_mat, patches,
                       preferred_element_type=jnp.float32) + b_col    # (Cout, HWp)

    # ---- conv1 + ReLU ------------------------------------------------------
    write_padded_rows(x_ref[0].astype(jnp.float32), W)
    h = conv3x3(w1_ref[...], b1_ref[...])                             # (Cout, HWp)

    # ---- conv2 (reuse the SAME scratch; h is already in wide layout) -------
    write_padded_rows(jnp.maximum(h, 0.0), Wp)
    y2 = conv3x3(w2_ref[...], b2_ref[...])                            # (Cout, HWp)

    # ---- compact width-padded result to dense H*W lanes, residual add,
    #      single lane-dense store -------------------------------------------
    res = jnp.concatenate([y2[:, y * Wp:y * Wp + W] for y in range(H)],
                          axis=-1)                                    # (Cout, H*W)
    o_ref[0] = (x_ref[0].astype(jnp.float32) + res).astype(o_ref.dtype)


def resblock_forward(x, w1, b1, w2, b2):
    """Pallas ResBlock.forward (mode='CRC', predict=False) for NCHW input.

    x:  (N, C, H, W);  w1, w2: (Cout, Cin, 3, 3) PyTorch Conv2d weights;  b*: (Cout,)
    """
    # TODO(synk): predict=True path (1x1-conv MLP gating `kernel*x + x`) is not
    # implemented; the default forward (predict=False, p=None) does not use it.
    N, C, H, W = x.shape
    assert w1.shape == (C, C, 3, 3) and w2.shape == (C, C, 3, 3)
    HW = H * W
    Wp, Hp = W + 2, H + 2
    Lflat = Hp * Wp + 2   # taps at discarded right-pad columns read 2 lanes past the image

    # Free reshape (no transpose): flat spatial onto the lane axis.
    x_flat = x.reshape(N, C, HW)

    # Hoisted weight prep: (Cout, Cin, 3, 3) -> (Cout, 9*Cin) im2col matrix,
    # column order (kh*3 + kw)*Cin + ci, pre-cast to f32 once.
    def prep_w(w):
        return jnp.transpose(w, (0, 2, 3, 1)).reshape(C, 9 * C).astype(jnp.float32)

    w1m, w2m = prep_w(w1), prep_w(w2)
    b1c = b1.reshape(C, 1).astype(jnp.float32)
    b2c = b2.reshape(C, 1).astype(jnp.float32)

    kernel = functools.partial(_resblock_kernel, H=H, W=W)

    out_flat = pl.pallas_call(
        kernel,
        out_shape=jax.ShapeDtypeStruct((N, C, HW), x.dtype),
        grid=(N,),
        in_specs=[
            pl.BlockSpec((1, C, HW), lambda n: (n, 0, 0)),
            pl.BlockSpec((C, 9 * C), lambda n: (0, 0)),
            pl.BlockSpec((C, 1), lambda n: (0, 0)),
            pl.BlockSpec((C, 9 * C), lambda n: (0, 0)),
            pl.BlockSpec((C, 1), lambda n: (0, 0)),
        ],
        out_specs=pl.BlockSpec((1, C, HW), lambda n: (n, 0, 0)),
        scratch_shapes=[pltpu.VMEM((C, Lflat), jnp.float32)],
        compiler_params=pltpu.CompilerParams(dimension_semantics=("parallel",)),
    )(x_flat, w1m, b1c, w2m, b2c)

    return out_flat.reshape(N, C, H, W)


def resblock_ref(x, w1, b1, w2, b2):
    """Pure-JAX reference mirroring PyTorch ResBlock (Conv-ReLU-Conv + skip)."""
    dn = ("NCHW", "OIHW", "NCHW")
    y = jax.lax.conv_general_dilated(x, w1, (1, 1), ((1, 1), (1, 1)),
                                     dimension_numbers=dn)
    y = y + b1.reshape(1, -1, 1, 1)
    y = jnp.maximum(y, 0.0)
    y = jax.lax.conv_general_dilated(y, w2, (1, 1), ((1, 1), (1, 1)),
                                     dimension_numbers=dn)
    y = y + b2.reshape(1, -1, 1, 1)
    return x + y


if __name__ == "__main__":
    key = jax.random.PRNGKey(0)
    k1, k2, k3, k4, k5 = jax.random.split(key, 5)

    N, C, H, W = 2, 4, 16, 16
    x = jax.random.normal(k1, (N, C, H, W), dtype=jnp.float32)
    w1 = 0.1 * jax.random.normal(k2, (C, C, 3, 3), dtype=jnp.float32)
    b1 = 0.1 * jax.random.normal(k3, (C,), dtype=jnp.float32)
    w2 = 0.1 * jax.random.normal(k4, (C, C, 3, 3), dtype=jnp.float32)
    b2 = 0.1 * jax.random.normal(k5, (C,), dtype=jnp.float32)

    out = resblock_forward(x, w1, b1, w2, b2)
    out = jax.block_until_ready(out)

    ref = resblock_ref(x, w1, b1, w2, b2)
    assert out.shape == (N, C, H, W), out.shape
    assert jnp.allclose(out, ref, atol=1e-4, rtol=1e-4), float(
        jnp.max(jnp.abs(out - ref)))

    print("KERNEL_OK")
</pallas_src>

<mosaic_0001>
module attributes {stable_mosaic.version = 11 : i64} {
  func.func @_resblock_kernel(%arg0: i32, %arg1: memref<1x4x256xf32, #tpu.memory_space<vmem>>, %arg2: memref<4x36xf32, #tpu.memory_space<vmem>>, %arg3: memref<4x1xf32, #tpu.memory_space<vmem>>, %arg4: memref<4x36xf32, #tpu.memory_space<vmem>>, %arg5: memref<4x1xf32, #tpu.memory_space<vmem>>, %arg6: memref<1x4x256xf32, #tpu.memory_space<vmem>>, %arg7: memref<4x326xf32, #tpu.memory_space<vmem>>) attributes {dimension_semantics = [#tpu.dimension_semantics<parallel>], iteration_bounds = array<i64: 2>, scalar_prefetch = 0 : i64, scratch_operands = 1 : i64, tpu.core_type = #tpu.core_type<tc>, window_params = [{transform_indices = @transform_0, window_bounds = array<i64: 1, 4, 256>}, {pipeline_mode = #tpu.pipeline_mode<synchronous>, transform_indices = @transform_1, window_bounds = array<i64: 4, 36>}, {pipeline_mode = #tpu.pipeline_mode<synchronous>, transform_indices = @transform_2, window_bounds = array<i64: 4, 1>}, {pipeline_mode = #tpu.pipeline_mode<synchronous>, transform_indices = @transform_3, window_bounds = array<i64: 4, 36>}, {pipeline_mode = #tpu.pipeline_mode<synchronous>, transform_indices = @transform_4, window_bounds = array<i64: 4, 1>}, {transform_indices = @transform_5, window_bounds = array<i64: 1, 4, 256>}]} {
    %cst = arith.constant 0.000000e+00 : f32
    %0 = vector.broadcast %cst : f32 to vector<4x18xf32>
    %c0 = arith.constant 0 : index
    %c0_0 = arith.constant 0 : index
    %1 = vector.load %arg7[%c0, %c0_0] : memref<4x326xf32, #tpu.memory_space<vmem>>, vector<4x18xf32>
    tpu.vector_store %arg7[%c0, %c0_0], %0 {strides = array<i32>} : memref<4x326xf32, #tpu.memory_space<vmem>>, vector<4x18xf32>,
    %cst_1 = arith.constant 0.000000e+00 : f32
    %2 = vector.broadcast %cst_1 : f32 to vector<4x20xf32>
    %c0_2 = arith.constant 0 : index
    %c306 = arith.constant 306 : index
    %3 = vector.load %arg7[%c0_2, %c306] : memref<4x326xf32, #tpu.memory_space<vmem>>, vector<4x20xf32>
    tpu.vector_store %arg7[%c0_2, %c306], %2 {strides = array<i32>} : memref<4x326xf32, #tpu.memory_space<vmem>>, vector<4x20xf32>,
    %cst_3 = arith.constant 0.000000e+00 : f32
    %4 = vector.broadcast %cst_3 : f32 to vector<4x1xf32>
    %c0_4 = arith.constant 0 : index
    %c0_5 = arith.constant 0 : index
    %c0_6 = arith.constant 0 : index
    %5 = vector.load %arg1[%c0_4, %c0_5, %c0_6] : memref<1x4x256xf32, #tpu.memory_space<vmem>>, vector<1x4x256xf32>
    %6 = vector.shape_cast %5 : vector<1x4x256xf32> to vector<4x256xf32>
    %7 = vector.extract_strided_slice %6 {offsets = [0, 0], sizes = [4, 16], strides = [1, 1]} : vector<4x256xf32> to vector<4x16xf32>
    %8 = tpu.concatenate %4, %7, %4 in 1 : vector<4x1xf32>, vector<4x16xf32>, vector<4x1xf32> -> vector<4x18xf32>
    %c0_7 = arith.constant 0 : index
    %c18 = arith.constant 18 : index
    %9 = vector.load %arg7[%c0_7, %c18] : memref<4x326xf32, #tpu.memory_space<vmem>>, vector<4x18xf32>
    tpu.vector_store %arg7[%c0_7, %c18], %8 {strides = array<i32>} : memref<4x326xf32, #tpu.memory_space<vmem>>, vector<4x18xf32>,
    %10 = vector.extract_strided_slice %6 {offsets = [0, 16], sizes = [4, 16], strides = [1, 1]} : vector<4x256xf32> to vector<4x16xf32>
    %11 = tpu.concatenate %4, %10, %4 in 1 : vector<4x1xf32>, vector<4x16xf32>, vector<4x1xf32> -> vector<4x18xf32>
    %c0_8 = arith.constant 0 : index
    %c36 = arith.constant 36 : index
    %12 = vector.load %arg7[%c0_8, %c36] : memref<4x326xf32, #tpu.memory_space<vmem>>, vector<4x18xf32>
    tpu.vector_store %arg7[%c0_8, %c36], %11 {strides = array<i32>} : memref<4x326xf32, #tpu.memory_space<vmem>>, vector<4x18xf32>,
    %13 = vector.extract_strided_slice %6 {offsets = [0, 32], sizes = [4, 16], strides = [1, 1]} : vector<4x256xf32> to vector<4x16xf32>
    %14 = tpu.concatenate %4, %13, %4 in 1 : vector<4x1xf32>, vector<4x16xf32>, vector<4x1xf32> -> vector<4x18xf32>
    %c0_9 = arith.constant 0 : index
    %c54 = arith.constant 54 : index
    %15 = vector.load %arg7[%c0_9, %c54] : memref<4x326xf32, #tpu.memory_space<vmem>>, vector<4x18xf32>
    tpu.vector_store %arg7[%c0_9, %c54], %14 {strides = array<i32>} : memref<4x326xf32, #tpu.memory_space<vmem>>, vector<4x18xf32>,
    %16 = vector.extract_strided_slice %6 {offsets = [0, 48], sizes = [4, 16], strides = [1, 1]} : vector<4x256xf32> to vector<4x16xf32>
    %17 = tpu.concatenate %4, %16, %4 in 1 : vector<4x1xf32>, vector<4x16xf32>, vector<4x1xf32> -> vector<4x18xf32>
    %c0_10 = arith.constant 0 : index
    %c72 = arith.constant 72 : index
    %18 = vector.load %arg7[%c0_10, %c72] : memref<4x326xf32, #tpu.memory_space<vmem>>, vector<4x18xf32>
    tpu.vector_store %arg7[%c0_10, %c72], %17 {strides = array<i32>} : memref<4x326xf32, #tpu.memory_space<vmem>>, vector<4x18xf32>,
    %19 = vector.extract_strided_slice %6 {offsets = [0, 64], sizes = [4, 16], strides = [1, 1]} : vector<4x256xf32> to vector<4x16xf32>
    %20 = tpu.concatenate %4, %19, %4 in 1 : vector<4x1xf32>, vector<4x16xf32>, vector<4x1xf32> -> vector<4x18xf32>
    %c0_11 = arith.constant 0 : index
    %c90 = arith.constant 90 : index
    %21 = vector.load %arg7[%c0_11, %c90] : memref<4x326xf32, #tpu.memory_space<vmem>>, vector<4x18xf32>
    tpu.vector_store %arg7[%c0_11, %c90], %20 {strides = array<i32>} : memref<4x326xf32, #tpu.memory_space<vmem>>, vector<4x18xf32>,
    %22 = vector.extract_strided_slice %6 {offsets = [0, 80], sizes = [4, 16], strides = [1, 1]} : vector<4x256xf32> to vector<4x16xf32>
    %23 = tpu.concatenate %4, %22, %4 in 1 : vector<4x1xf32>, vector<4x16xf32>, vector<4x1xf32> -> vector<4x18xf32>
    %c0_12 = arith.constant 0 : index
    %c108 = arith.constant 108 : index
    %24 = vector.load %arg7[%c0_12, %c108] : memref<4x326xf32, #tpu.memory_space<vmem>>, vector<4x18xf32>
    tpu.vector_store %arg7[%c0_12, %c108], %23 {strides = array<i32>} : memref<4x326xf32, #tpu.memory_space<vmem>>, vector<4x18xf32>,
    %25 = vector.extract_strided_slice %6 {offsets = [0, 96], sizes = [4, 16], strides = [1, 1]} : vector<4x256xf32> to vector<4x16xf32>
    %26 = tpu.concatenate %4, %25, %4 in 1 : vector<4x1xf32>, vector<4x16xf32>, vector<4x1xf32> -> vector<4x18xf32>
    %c0_13 = arith.constant 0 : index
    %c126 = arith.constant 126 : index
    %27 = vector.load %arg7[%c0_13, %c126] : memref<4x326xf32, #tpu.memory_space<vmem>>, vector<4x18xf32>
    tpu.vector_store %arg7[%c0_13, %c126], %26 {strides = array<i32>} : memref<4x326xf32, #tpu.memory_space<vmem>>, vector<4x18xf32>,
    %28 = vector.extract_strided_slice %6 {offsets = [0, 112], sizes = [4, 16], strides = [1, 1]} : vector<4x256xf32> to vector<4x16xf32>
    %29 = tpu.concatenate %4, %28, %4 in 1 : vector<4x1xf32>, vector<4x16xf32>, vector<4x1xf32> -> vector<4x18xf32>
    %c0_14 = arith.constant 0 : index
    %c144 = arith.constant 144 : index
    %30 = vector.load %arg7[%c0_14, %c144] : memref<4x326xf32, #tpu.memory_space<vmem>>, vector<4x18xf32>
    tpu.vector_store %arg7[%c0_14, %c144], %29 {strides = array<i32>} : memref<4x326xf32, #tpu.memory_space<vmem>>, vector<4x18xf32>,
    %31 = vector.extract_strided_slice %6 {offsets = [0, 128], sizes = [4, 16], strides = [1, 1]} : vector<4x256xf32> to vector<4x16xf32>
    %32 = tpu.concatenate %4, %31, %4 in 1 : vector<4x1xf32>, vector<4x16xf32>, vector<4x1xf32> -> vector<4x18xf32>
    %c0_15 = arith.constant 0 : index
    %c162 = arith.constant 162 : index
    %33 = vector.load %arg7[%c0_15, %c162] : memref<4x326xf32, #tpu.memory_space<vmem>>, vector<4x18xf32>
    tpu.vector_store %arg7[%c0_15, %c162], %32 {strides = array<i32>} : memref<4x326xf32, #tpu.memory_space<vmem>>, vector<4x18xf32>,
    %34 = vector.extract_strided_slice %6 {offsets = [0, 144], sizes = [4, 16], strides = [1, 1]} : vector<4x256xf32> to vector<4x16xf32>
    %35 = tpu.concatenate %4, %34, %4 in 1 : vector<4x1xf32>, vector<4x16xf32>, vector<4x1xf32> -> vector<4x18xf32>
    %c0_16 = arith.constant 0 : index
    %c180 = arith.constant 180 : index
    %36 = vector.load %arg7[%c0_16, %c180] : memref<4x326xf32, #tpu.memory_space<vmem>>, vector<4x18xf32>
    tpu.vector_store %arg7[%c0_16, %c180], %35 {strides = array<i32>} : memref<4x326xf32, #tpu.memory_space<vmem>>, vector<4x18xf32>,
    %37 = vector.extract_strided_slice %6 {offsets = [0, 160], sizes = [4, 16], strides = [1, 1]} : vector<4x256xf32> to vector<4x16xf32>
    %38 = tpu.concatenate %4, %37, %4 in 1 : vector<4x1xf32>, vector<4x16xf32>, vector<4x1xf32> -> vector<4x18xf32>
    %c0_17 = arith.constant 0 : index
    %c198 = arith.constant 198 : index
    %39 = vector.load %arg7[%c0_17, %c198] : memref<4x326xf32, #tpu.memory_space<vmem>>, vector<4x18xf32>
    tpu.vector_store %arg7[%c0_17, %c198], %38 {strides = array<i32>} : memref<4x326xf32, #tpu.memory_space<vmem>>, vector<4x18xf32>,
    %40 = vector.extract_strided_slice %6 {offsets = [0, 176], sizes = [4, 16], strides = [1, 1]} : vector<4x256xf32> to vector<4x16xf32>
    %41 = tpu.concatenate %4, %40, %4 in 1 : vector<4x1xf32>, vector<4x16xf32>, vector<4x1xf32> -> vector<4x18xf32>
    %c0_18 = arith.constant 0 : index
    %c216 = arith.constant 216 : index
    %42 = vector.load %arg7[%c0_18, %c216] : memref<4x326xf32, #tpu.memory_space<vmem>>, vector<4x18xf32>
    tpu.vector_store %arg7[%c0_18, %c216], %41 {strides = array<i32>} : memref<4x326xf32, #tpu.memory_space<vmem>>, vector<4x18xf32>,
    %43 = vector.extract_strided_slice %6 {offsets = [0, 192], sizes = [4, 16], strides = [1, 1]} : vector<4x256xf32> to vector<4x16xf32>
    %44 = tpu.concatenate %4, %43, %4 in 1 : vector<4x1xf32>, vector<4x16xf32>, vector<4x1xf32> -> vector<4x18xf32>
    %c0_19 = arith.constant 0 : index
    %c234 = arith.constant 234 : index
    %45 = vector.load %arg7[%c0_19, %c234] : memref<4x326xf32, #tpu.memory_space<vmem>>, vector<4x18xf32>
    tpu.vector_store %arg7[%c0_19, %c234], %44 {strides = array<i32>} : memref<4x326xf32, #tpu.memory_space<vmem>>, vector<4x18xf32>,
    %46 = vector.extract_strided_slice %6 {offsets = [0, 208], sizes = [4, 16], strides = [1, 1]} : vector<4x256xf32> to vector<4x16xf32>
    %47 = tpu.concatenate %4, %46, %4 in 1 : vector<4x1xf32>, vector<4x16xf32>, vector<4x1xf32> -> vector<4x18xf32>
    %c0_20 = arith.constant 0 : index
    %c252 = arith.constant 252 : index
    %48 = vector.load %arg7[%c0_20, %c252] : memref<4x326xf32, #tpu.memory_space<vmem>>, vector<4x18xf32>
    tpu.vector_store %arg7[%c0_20, %c252], %47 {strides = array<i32>} : memref<4x326xf32, #tpu.memory_space<vmem>>, vector<4x18xf32>,
    %49 = vector.extract_strided_slice %6 {offsets = [0, 224], sizes = [4, 16], strides = [1, 1]} : vector<4x256xf32> to vector<4x16xf32>
    %50 = tpu.concatenate %4, %49, %4 in 1 : vector<4x1xf32>, vector<4x16xf32>, vector<4x1xf32> -> vector<4x18xf32>
    %c0_21 = arith.constant 0 : index
    %c270 = arith.constant 270 : index
    %51 = vector.load %arg7[%c0_21, %c270] : memref<4x326xf32, #tpu.memory_space<vmem>>, vector<4x18xf32>
    tpu.vector_store %arg7[%c0_21, %c270], %50 {strides = array<i32>} : memref<4x326xf32, #tpu.memory_space<vmem>>, vector<4x18xf32>,
    %52 = vector.extract_strided_slice %6 {offsets = [0, 240], sizes = [4, 16], strides = [1, 1]} : vector<4x256xf32> to vector<4x16xf32>
    %53 = tpu.concatenate %4, %52, %4 in 1 : vector<4x1xf32>, vector<4x16xf32>, vector<4x1xf32> -> vector<4x18xf32>
    %c0_22 = arith.constant 0 : index
    %c288 = arith.constant 288 : index
    %54 = vector.load %arg7[%c0_22, %c288] : memref<4x326xf32, #tpu.memory_space<vmem>>, vector<4x18xf32>
    tpu.vector_store %arg7[%c0_22, %c288], %53 {strides = array<i32>} : memref<4x326xf32, #tpu.memory_space<vmem>>, vector<4x18xf32>,
    %c0_23 = arith.constant 0 : index
    %c0_24 = arith.constant 0 : index
    %55 = vector.load %arg2[%c0_23, %c0_24] : memref<4x36xf32, #tpu.memory_space<vmem>>, vector<4x36xf32>
    %c0_25 = arith.constant 0 : index
    %c0_26 = arith.constant 0 : index
    %56 = vector.load %arg3[%c0_25, %c0_26] : memref<4x1xf32, #tpu.memory_space<vmem>>, vector<4x1xf32>
    %c0_27 = arith.constant 0 : index
    %c0_28 = arith.constant 0 : index
    %57 = vector.load %arg7[%c0_27, %c0_28] : memref<4x326xf32, #tpu.memory_space<vmem>>, vector<4x326xf32>
    %58 = vector.extract_strided_slice %57 {offsets = [0, 0], sizes = [4, 288], strides = [1, 1]} : vector<4x326xf32> to vector<4x288xf32>
    %59 = vector.extract_strided_slice %57 {offsets = [0, 1], sizes = [4, 288], strides = [1, 1]} : vector<4x326xf32> to vector<4x288xf32>
    %60 = vector.extract_strided_slice %57 {offsets = [0, 2], sizes = [4, 288], strides = [1, 1]} : vector<4x326xf32> to vector<4x288xf32>
    %61 = vector.extract_strided_slice %57 {offsets = [0, 18], sizes = [4, 288], strides = [1, 1]} : vector<4x326xf32> to vector<4x288xf32>
    %62 = vector.extract_strided_slice %57 {offsets = [0, 19], sizes = [4, 288], strides = [1, 1]} : vector<4x326xf32> to vector<4x288xf32>
    %63 = vector.extract_strided_slice %57 {offsets = [0, 20], sizes = [4, 288], strides = [1, 1]} : vector<4x326xf32> to vector<4x288xf32>
    %64 = vector.extract_strided_slice %57 {offsets = [0, 36], sizes = [4, 288], strides = [1, 1]} : vector<4x326xf32> to vector<4x288xf32>
    %65 = vector.extract_strided_slice %57 {offsets = [0, 37], sizes = [4, 288], strides = [1, 1]} : vector<4x326xf32> to vector<4x288xf32>
    %66 = vector.extract_strided_slice %57 {offsets = [0, 38], sizes = [4, 288], strides = [1, 1]} : vector<4x326xf32> to vector<4x288xf32>
    %67 = tpu.concatenate %58, %59, %60, %61, %62, %63, %64, %65, %66 in 0 : vector<4x288xf32>, vector<4x288xf32>, vector<4x288xf32>, vector<4x288xf32>, vector<4x288xf32>, vector<4x288xf32>, vector<4x288xf32>, vector<4x288xf32>, vector<4x288xf32> -> vector<36x288xf32>
    %cst_29 = arith.constant dense<0.000000e+00> : vector<4x288xf32>
    %68 = tpu.matmul %55, %67, %cst_29 {dimension_numbers = #tpu.dot_dimension_numbers<[1], [0], [0], [1], [0, 0, 1, 1], [], []>} : vector<4x36xf32>, vector<36x288xf32>, vector<4x288xf32> -> vector<4x288xf32>
    %69 = vector.broadcast %56 : vector<4x1xf32> to vector<4x288xf32>
    %70 = arith.addf %68, %69 : vector<4x288xf32>
    %cst_30 = arith.constant 0.000000e+00 : f32
    %71 = vector.broadcast %cst_30 : f32 to vector<4x288xf32>
    %72 = arith.maximumf %70, %71 : vector<4x288xf32>
    %73 = vector.extract_strided_slice %72 {offsets = [0, 0], sizes = [4, 16], strides = [1, 1]} : vector<4x288xf32> to vector<4x16xf32>
    %74 = tpu.concatenate %4, %73, %4 in 1 : vector<4x1xf32>, vector<4x16xf32>, vector<4x1xf32> -> vector<4x18xf32>
    %c0_31 = arith.constant 0 : index
    %c18_32 = arith.constant 18 : index
    %75 = vector.load %arg7[%c0_31, %c18_32] : memref<4x326xf32, #tpu.memory_space<vmem>>, vector<4x18xf32>
    tpu.vector_store %arg7[%c0_31, %c18_32], %74 {strides = array<i32>} : memref<4x326xf32, #tpu.memory_space<vmem>>, vector<4x18xf32>,
    %76 = vector.extract_strided_slice %72 {offsets = [0, 18], sizes = [4, 16], strides = [1, 1]} : vector<4x288xf32> to vector<4x16xf32>
    %77 = tpu.concatenate %4, %76, %4 in 1 : vector<4x1xf32>, vector<4x16xf32>, vector<4x1xf32> -> vector<4x18xf32>
    %c0_33 = arith.constant 0 : index
    %c36_34 = arith.constant 36 : index
    %78 = vector.load %arg7[%c0_33, %c36_34] : memref<4x326xf32, #tpu.memory_space<vmem>>, vector<4x18xf32>
    tpu.vector_store %arg7[%c0_33, %c36_34], %77 {strides = array<i32>} : memref<4x326xf32, #tpu.memory_space<vmem>>, vector<4x18xf32>,
    %79 = vector.extract_strided_slice %72 {offsets = [0, 36], sizes = [4, 16], strides = [1, 1]} : vector<4x288xf32> to vector<4x16xf32>
    %80 = tpu.concatenate %4, %79, %4 in 1 : vector<4x1xf32>, vector<4x16xf32>, vector<4x1xf32> -> vector<4x18xf32>
    %c0_35 = arith.constant 0 : index
    %c54_36 = arith.constant 54 : index
    %81 = vector.load %arg7[%c0_35, %c54_36] : memref<4x326xf32, #tpu.memory_space<vmem>>, vector<4x18xf32>
    tpu.vector_store %arg7[%c0_35, %c54_36], %80 {strides = array<i32>} : memref<4x326xf32, #tpu.memory_space<vmem>>, vector<4x18xf32>,
    %82 = vector.extract_strided_slice %72 {offsets = [0, 54], sizes = [4, 16], strides = [1, 1]} : vector<4x288xf32> to vector<4x16xf32>
    %83 = tpu.concatenate %4, %82, %4 in 1 : vector<4x1xf32>, vector<4x16xf32>, vector<4x1xf32> -> vector<4x18xf32>
    %c0_37 = arith.constant 0 : index
    %c72_38 = arith.constant 72 : index
    %84 = vector.load %arg7[%c0_37, %c72_38] : memref<4x326xf32, #tpu.memory_space<vmem>>, vector<4x18xf32>
    tpu.vector_store %arg7[%c0_37, %c72_38], %83 {strides = array<i32>} : memref<4x326xf32, #tpu.memory_space<vmem>>, vector<4x18xf32>,
    %85 = vector.extract_strided_slice %72 {offsets = [0, 72], sizes = [4, 16], strides = [1, 1]} : vector<4x288xf32> to vector<4x16xf32>
    %86 = tpu.concatenate %4, %85, %4 in 1 : vector<4x1xf32>, vector<4x16xf32>, vector<4x1xf32> -> vector<4x18xf32>
    %c0_39 = arith.constant 0 : index
    %c90_40 = arith.constant 90 : index
    %87 = vector.load %arg7[%c0_39, %c90_40] : memref<4x326xf32, #tpu.memory_space<vmem>>, vector<4x18xf32>
    tpu.vector_store %arg7[%c0_39, %c90_40], %86 {strides = array<i32>} : memref<4x326xf32, #tpu.memory_space<vmem>>, vector<4x18xf32>,
    %88 = vector.extract_strided_slice %72 {offsets = [0, 90], sizes = [4, 16], strides = [1, 1]} : vector<4x288xf32> to vector<4x16xf32>
    %89 = tpu.concatenate %4, %88, %4 in 1 : vector<4x1xf32>, vector<4x16xf32>, vector<4x1xf32> -> vector<4x18xf32>
    %c0_41 = arith.constant 0 : index
    %c108_42 = arith.constant 108 : index
    %90 = vector.load %arg7[%c0_41, %c108_42] : memref<4x326xf32, #tpu.memory_space<vmem>>, vector<4x18xf32>
    tpu.vector_store %arg7[%c0_41, %c108_42], %89 {strides = array<i32>} : memref<4x326xf32, #tpu.memory_space<vmem>>, vector<4x18xf32>,
    %91 = vector.extract_strided_slice %72 {offsets = [0, 108], sizes = [4, 16], strides = [1, 1]} : vector<4x288xf32> to vector<4x16xf32>
    %92 = tpu.concatenate %4, %91, %4 in 1 : vector<4x1xf32>, vector<4x16xf32>, vector<4x1xf32> -> vector<4x18xf32>
    %c0_43 = arith.constant 0 : index
    %c126_44 = arith.constant 126 : index
    %93 = vector.load %arg7[%c0_43, %c126_44] : memref<4x326xf32, #tpu.memory_space<vmem>>, vector<4x18xf32>
    tpu.vector_store %arg7[%c0_43, %c126_44], %92 {strides = array<i32>} : memref<4x326xf32, #tpu.memory_space<vmem>>, vector<4x18xf32>,
    %94 = vector.extract_strided_slice %72 {offsets = [0, 126], sizes = [4, 16], strides = [1, 1]} : vector<4x288xf32> to vector<4x16xf32>
    %95 = tpu.concatenate %4, %94, %4 in 1 : vector<4x1xf32>, vector<4x16xf32>, vector<4x1xf32> -> vector<4x18xf32>
    %c0_45 = arith.constant 0 : index
    %c144_46 = arith.constant 144 : index
    %96 = vector.load %arg7[%c0_45, %c144_46] : memref<4x326xf32, #tpu.memory_space<vmem>>, vector<4x18xf32>
    tpu.vector_store %arg7[%c0_45, %c144_46], %95 {strides = array<i32>} : memref<4x326xf32, #tpu.memory_space<vmem>>, vector<4x18xf32>,
    %97 = vector.extract_strided_slice %72 {offsets = [0, 144], sizes = [4, 16], strides = [1, 1]} : vector<4x288xf32> to vector<4x16xf32>
    %98 = tpu.concatenate %4, %97, %4 in 1 : vector<4x1xf32>, vector<4x16xf32>, vector<4x1xf32> -> vector<4x18xf32>
    %c0_47 = arith.constant 0 : index
    %c162_48 = arith.constant 162 : index
    %99 = vector.load %arg7[%c0_47, %c162_48] : memref<4x326xf32, #tpu.memory_space<vmem>>, vector<4x18xf32>
    tpu.vector_store %arg7[%c0_47, %c162_48], %98 {strides = array<i32>} : memref<4x326xf32, #tpu.memory_space<vmem>>, vector<4x18xf32>,
    %100 = vector.extract_strided_slice %72 {offsets = [0, 162], sizes = [4, 16], strides = [1, 1]} : vector<4x288xf32> to vector<4x16xf32>
    %101 = tpu.concatenate %4, %100, %4 in 1 : vector<4x1xf32>, vector<4x16xf32>, vector<4x1xf32> -> vector<4x18xf32>
    %c0_49 = arith.constant 0 : index
    %c180_50 = arith.constant 180 : index
    %102 = vector.load %arg7[%c0_49, %c180_50] : memref<4x326xf32, #tpu.memory_space<vmem>>, vector<4x18xf32>
    tpu.vector_store %arg7[%c0_49, %c180_50], %101 {strides = array<i32>} : memref<4x326xf32, #tpu.memory_space<vmem>>, vector<4x18xf32>,
    %103 = vector.extract_strided_slice %72 {offsets = [0, 180], sizes = [4, 16], strides = [1, 1]} : vector<4x288xf32> to vector<4x16xf32>
    %104 = tpu.concatenate %4, %103, %4 in 1 : vector<4x1xf32>, vector<4x16xf32>, vector<4x1xf32> -> vector<4x18xf32>
    %c0_51 = arith.constant 0 : index
    %c198_52 = arith.constant 198 : index
    %105 = vector.load %arg7[%c0_51, %c198_52] : memref<4x326xf32, #tpu.memory_space<vmem>>, vector<4x18xf32>
    tpu.vector_store %arg7[%c0_51, %c198_52], %104 {strides = array<i32>} : memref<4x326xf32, #tpu.memory_space<vmem>>, vector<4x18xf32>,
    %106 = vector.extract_strided_slice %72 {offsets = [0, 198], sizes = [4, 16], strides = [1, 1]} : vector<4x288xf32> to vector<4x16xf32>
    %107 = tpu.concatenate %4, %106, %4 in 1 : vector<4x1xf32>, vector<4x16xf32>, vector<4x1xf32> -> vector<4x18xf32>
    %c0_53 = arith.constant 0 : index
    %c216_54 = arith.constant 216 : index
    %108 = vector.load %arg7[%c0_53, %c216_54] : memref<4x326xf32, #tpu.memory_space<vmem>>, vector<4x18xf32>
    tpu.vector_store %arg7[%c0_53, %c216_54], %107 {strides = array<i32>} : memref<4x326xf32, #tpu.memory_space<vmem>>, vector<4x18xf32>,
    %109 = vector.extract_strided_slice %72 {offsets = [0, 216], sizes = [4, 16], strides = [1, 1]} : vector<4x288xf32> to vector<4x16xf32>
    %110 = tpu.concatenate %4, %109, %4 in 1 : vector<4x1xf32>, vector<4x16xf32>, vector<4x1xf32> -> vector<4x18xf32>
    %c0_55 = arith.constant 0 : index
    %c234_56 = arith.constant 234 : index
    %111 = vector.load %arg7[%c0_55, %c234_56] : memref<4x326xf32, #tpu.memory_space<vmem>>, vector<4x18xf32>
    tpu.vector_store %arg7[%c0_55, %c234_56], %110 {strides = array<i32>} : memref<4x326xf32, #tpu.memory_space<vmem>>, vector<4x18xf32>,
    %112 = vector.extract_strided_slice %72 {offsets = [0, 234], sizes = [4, 16], strides = [1, 1]} : vector<4x288xf32> to vector<4x16xf32>
    %113 = tpu.concatenate %4, %112, %4 in 1 : vector<4x1xf32>, vector<4x16xf32>, vector<4x1xf32> -> vector<4x18xf32>
    %c0_57 = arith.constant 0 : index
    %c252_58 = arith.constant 252 : index
    %114 = vector.load %arg7[%c0_57, %c252_58] : memref<4x326xf32, #tpu.memory_space<vmem>>, vector<4x18xf32>
    tpu.vector_store %arg7[%c0_57, %c252_58], %113 {strides = array<i32>} : memref<4x326xf32, #tpu.memory_space<vmem>>, vector<4x18xf32>,
    %115 = vector.extract_strided_slice %72 {offsets = [0, 252], sizes = [4, 16], strides = [1, 1]} : vector<4x288xf32> to vector<4x16xf32>
    %116 = tpu.concatenate %4, %115, %4 in 1 : vector<4x1xf32>, vector<4x16xf32>, vector<4x1xf32> -> vector<4x18xf32>
    %c0_59 = arith.constant 0 : index
    %c270_60 = arith.constant 270 : index
    %117 = vector.load %arg7[%c0_59, %c270_60] : memref<4x326xf32, #tpu.memory_space<vmem>>, vector<4x18xf32>
    tpu.vector_store %arg7[%c0_59, %c270_60], %116 {strides = array<i32>} : memref<4x326xf32, #tpu.memory_space<vmem>>, vector<4x18xf32>,
    %118 = vector.extract_strided_slice %72 {offsets = [0, 270], sizes = [4, 16], strides = [1, 1]} : vector<4x288xf32> to vector<4x16xf32>
    %119 = tpu.concatenate %4, %118, %4 in 1 : vector<4x1xf32>, vector<4x16xf32>, vector<4x1xf32> -> vector<4x18xf32>
    %c0_61 = arith.constant 0 : index
    %c288_62 = arith.constant 288 : index
    %120 = vector.load %arg7[%c0_61, %c288_62] : memref<4x326xf32, #tpu.memory_space<vmem>>, vector<4x18xf32>
    tpu.vector_store %arg7[%c0_61, %c288_62], %119 {strides = array<i32>} : memref<4x326xf32, #tpu.memory_space<vmem>>, vector<4x18xf32>,
    %c0_63 = arith.constant 0 : index
    %c0_64 = arith.constant 0 : index
    %121 = vector.load %arg4[%c0_63, %c0_64] : memref<4x36xf32, #tpu.memory_space<vmem>>, vector<4x36xf32>
    %c0_65 = arith.constant 0 : index
    %c0_66 = arith.constant 0 : index
    %122 = vector.load %arg5[%c0_65, %c0_66] : memref<4x1xf32, #tpu.memory_space<vmem>>, vector<4x1xf32>
    %c0_67 = arith.constant 0 : index
    %c0_68 = arith.constant 0 : index
    %123 = vector.load %arg7[%c0_67, %c0_68] : memref<4x326xf32, #tpu.memory_space<vmem>>, vector<4x326xf32>
    %124 = vector.extract_strided_slice %123 {offsets = [0, 0], sizes = [4, 288], strides = [1, 1]} : vector<4x326xf32> to vector<4x288xf32>
    %125 = vector.extract_strided_slice %123 {offsets = [0, 1], sizes = [4, 288], strides = [1, 1]} : vector<4x326xf32> to vector<4x288xf32>
    %126 = vector.extract_strided_slice %123 {offsets = [0, 2], sizes = [4, 288], strides = [1, 1]} : vector<4x326xf32> to vector<4x288xf32>
    %127 = vector.extract_strided_slice %123 {offsets = [0, 18], sizes = [4, 288], strides = [1, 1]} : vector<4x326xf32> to vector<4x288xf32>
    %128 = vector.extract_strided_slice %123 {offsets = [0, 19], sizes = [4, 288], strides = [1, 1]} : vector<4x326xf32> to vector<4x288xf32>
    %129 = vector.extract_strided_slice %123 {offsets = [0, 20], sizes = [4, 288], strides = [1, 1]} : vector<4x326xf32> to vector<4x288xf32>
    %130 = vector.extract_strided_slice %123 {offsets = [0, 36], sizes = [4, 288], strides = [1, 1]} : vector<4x326xf32> to vector<4x288xf32>
    %131 = vector.extract_strided_slice %123 {offsets = [0, 37], sizes = [4, 288], strides = [1, 1]} : vector<4x326xf32> to vector<4x288xf32>
    %132 = vector.extract_strided_slice %123 {offsets = [0, 38], sizes = [4, 288], strides = [1, 1]} : vector<4x326xf32> to vector<4x288xf32>
    %133 = tpu.concatenate %124, %125, %126, %127, %128, %129, %130, %131, %132 in 0 : vector<4x288xf32>, vector<4x288xf32>, vector<4x288xf32>, vector<4x288xf32>, vector<4x288xf32>, vector<4x288xf32>, vector<4x288xf32>, vector<4x288xf32>, vector<4x288xf32> -> vector<36x288xf32>
    %cst_69 = arith.constant dense<0.000000e+00> : vector<4x288xf32>
    %134 = tpu.matmul %121, %133, %cst_69 {dimension_numbers = #tpu.dot_dimension_numbers<[1], [0], [0], [1], [0, 0, 1, 1], [], []>} : vector<4x36xf32>, vector<36x288xf32>, vector<4x288xf32> -> vector<4x288xf32>
    %135 = vector.broadcast %122 : vector<4x1xf32> to vector<4x288xf32>
    %136 = arith.addf %134, %135 : vector<4x288xf32>
    %137 = vector.extract_strided_slice %136 {offsets = [0, 0], sizes = [4, 16], strides = [1, 1]} : vector<4x288xf32> to vector<4x16xf32>
    %138 = vector.extract_strided_slice %136 {offsets = [0, 18], sizes = [4, 16], strides = [1, 1]} : vector<4x288xf32> to vector<4x16xf32>
    %139 = vector.extract_strided_slice %136 {offsets = [0, 36], sizes = [4, 16], strides = [1, 1]} : vector<4x288xf32> to vector<4x16xf32>
    %140 = vector.extract_strided_slice %136 {offsets = [0, 54], sizes = [4, 16], strides = [1, 1]} : vector<4x288xf32> to vector<4x16xf32>
    %141 = vector.extract_strided_slice %136 {offsets = [0, 72], sizes = [4, 16], strides = [1, 1]} : vector<4x288xf32> to vector<4x16xf32>
    %142 = vector.extract_strided_slice %136 {offsets = [0, 90], sizes = [4, 16], strides = [1, 1]} : vector<4x288xf32> to vector<4x16xf32>
    %143 = vector.extract_strided_slice %136 {offsets = [0, 108], sizes = [4, 16], strides = [1, 1]} : vector<4x288xf32> to vector<4x16xf32>
    %144 = vector.extract_strided_slice %136 {offsets = [0, 126], sizes = [4, 16], strides = [1, 1]} : vector<4x288xf32> to vector<4x16xf32>
    %145 = vector.extract_strided_slice %136 {offsets = [0, 144], sizes = [4, 16], strides = [1, 1]} : vector<4x288xf32> to vector<4x16xf32>
    %146 = vector.extract_strided_slice %136 {offsets = [0, 162], sizes = [4, 16], strides = [1, 1]} : vector<4x288xf32> to vector<4x16xf32>
    %147 = vector.extract_strided_slice %136 {offsets = [0, 180], sizes = [4, 16], strides = [1, 1]} : vector<4x288xf32> to vector<4x16xf32>
    %148 = vector.extract_strided_slice %136 {offsets = [0, 198], sizes = [4, 16], strides = [1, 1]} : vector<4x288xf32> to vector<4x16xf32>
    %149 = vector.extract_strided_slice %136 {offsets = [0, 216], sizes = [4, 16], strides = [1, 1]} : vector<4x288xf32> to vector<4x16xf32>
    %150 = vector.extract_strided_slice %136 {offsets = [0, 234], sizes = [4, 16], strides = [1, 1]} : vector<4x288xf32> to vector<4x16xf32>
    %151 = vector.extract_strided_slice %136 {offsets = [0, 252], sizes = [4, 16], strides = [1, 1]} : vector<4x288xf32> to vector<4x16xf32>
    %152 = vector.extract_strided_slice %136 {offsets = [0, 270], sizes = [4, 16], strides = [1, 1]} : vector<4x288xf32> to vector<4x16xf32>
    %153 = tpu.concatenate %137, %138, %139, %140, %141, %142, %143, %144, %145, %146, %147, %148, %149, %150, %151, %152 in 1 : vector<4x16xf32>, vector<4x16xf32>, vector<4x16xf32>, vector<4x16xf32>, vector<4x16xf32>, vector<4x16xf32>, vector<4x16xf32>, vector<4x16xf32>, vector<4x16xf32>, vector<4x16xf32>, vector<4x16xf32>, vector<4x16xf32>, vector<4x16xf32>, vector<4x16xf32>, vector<4x16xf32>, vector<4x16xf32> -> vector<4x256xf32>
    %c0_70 = arith.constant 0 : index
    %c0_71 = arith.constant 0 : index
    %c0_72 = arith.constant 0 : index
    %154 = vector.load %arg1[%c0_70, %c0_71, %c0_72] : memref<1x4x256xf32, #tpu.memory_space<vmem>>, vector<1x4x256xf32>
    %155 = vector.shape_cast %154 : vector<1x4x256xf32> to vector<4x256xf32>
    %156 = arith.addf %155, %153 : vector<4x256xf32>
    %c0_73 = arith.constant 0 : index
    %c0_74 = arith.constant 0 : index
    %c0_75 = arith.constant 0 : index
    %157 = vector.load %arg6[%c0_73, %c0_74, %c0_75] : memref<1x4x256xf32, #tpu.memory_space<vmem>>, vector<1x4x256xf32>
    %158 = vector.shape_cast %157 : vector<1x4x256xf32> to vector<4x256xf32>
    %159 = vector.shape_cast %156 : vector<4x256xf32> to vector<1x4x256xf32>
    tpu.vector_store %arg6[%c0_73, %c0_74, %c0_75], %159 {strides = array<i32>} : memref<1x4x256xf32, #tpu.memory_space<vmem>>, vector<1x4x256xf32>,
    return
  }
  func.func @transform_0(%arg0: i32) -> (i32, i32, i32) {
    %c0_i32 = arith.constant 0 : i32
    %c0_i32_0 = arith.constant 0 : i32
    %c0_i32_1 = arith.constant 0 : i32
    return %arg0, %c0_i32, %c0_i32_0 : i32, i32, i32
  }
  func.func @transform_1(%arg0: i32) -> (i32, i32) {
    %c0_i32 = arith.constant 0 : i32
    %c0_i32_0 = arith.constant 0 : i32
    %c0_i32_1 = arith.constant 0 : i32
    return %c0_i32, %c0_i32_0 : i32, i32
  }
  func.func @transform_2(%arg0: i32) -> (i32, i32) {
    %c0_i32 = arith.constant 0 : i32
    %c0_i32_0 = arith.constant 0 : i32
    %c0_i32_1 = arith.constant 0 : i32
    return %c0_i32, %c0_i32_0 : i32, i32
  }
  func.func @transform_3(%arg0: i32) -> (i32, i32) {
    %c0_i32 = arith.constant 0 : i32
    %c0_i32_0 = arith.constant 0 : i32
    %c0_i32_1 = arith.constant 0 : i32
    return %c0_i32, %c0_i32_0 : i32, i32
  }
  func.func @transform_4(%arg0: i32) -> (i32, i32) {
    %c0_i32 = arith.constant 0 : i32
    %c0_i32_0 = arith.constant 0 : i32
    %c0_i32_1 = arith.constant 0 : i32
    return %c0_i32, %c0_i32_0 : i32, i32
  }
  func.func @transform_5(%arg0: i32) -> (i32, i32, i32) {
    %c0_i32 = arith.constant 0 : i32
    %c0_i32_0 = arith.constant 0 : i32
    %c0_i32_1 = arith.constant 0 : i32
    return %arg0, %c0_i32, %c0_i32_0 : i32, i32, i32
  }
}

</mosaic_0001>

<bundles_post_ra>
// kernel: tpu_custom_call.1
= control target key start
LH: loop header
LB: loop body
LE: loop exit
PB: predicated region body
PF: predicated region fallthrough
CT: control target
= control target key end

     0   :  { %10 = vsyncpa [#allocation4], 0  ;;  %s2181_s0 = inlined_call_operand.hbm [shape: f32[2,4,256], index: 0, kind: input, shape index: {}]   ;;  %s2182_s1 = inlined_call_operand.vmem [shape: f32[4,36], index: 1, kind: input, shape index: {}]   ;;  %s2183_s2 = inlined_call_operand.vmem [shape: f32[4,1], index: 2, kind: input, shape index: {}]   ;;  %s2184_s3 = inlined_call_operand.vmem [shape: f32[4,36], index: 3, kind: input, shape index: {}]   ;;  %s2185_s4 = inlined_call_operand.vmem [shape: f32[4,1], index: 4, kind: input, shape index: {}]   ;;  %s2186_s5 = inlined_call_operand.hbm [shape: f32[2,4,256], index: 5, kind: output, shape index: {}]  }
   0x1   :  { %12 = vsyncpa [#allocation4 + $0x1], 0 }
   0x2   :  { %13 = vsyncpa [#allocation5], 0 }
   0x3   :  { %15 = vsyncpa [#allocation5 + $0x1], 0  ;;  %s1671_s18 = smov 0   ;;  %s1673_s19 = smov 0  }
   0x4   :  { %s1675_s20 = smov 0   ;;  %s1677_s21 = smov 0  }
   0x5 LB: > { %s1692_s22 = sadd.s32 4294967295, %s1581_s21   ;;  %s1316_s23 = sadd.s32 4294967294, %s1581_s21   ;;  %s1581_s21 = sphi %s1677_s21, %s2283_s21   ;;  %s1577_s20 = sphi %s1675_s20, %s2282_s20   ;;  %s1573_s19 = sphi %s1673_s19, %s2281_s19   ;;  %s1569_s18 = sphi %s1671_s18, %s2280_s18  }
   0x6   : > { %s1696_s24 = sadd.s32 1, %s1581_s21   ;;  %s28_s25 = sadd.s32 1, %s1577_s20 }
   0x7   : > { %s25_s26 = ssub.s32 %s1581_s21, %s1696_s24  ;;  %p35_p0 = scmp.ne.s32.totalorder %s1577_s20, %s1573_s19 }
   0x8   : > { %p26_p1 = scmp.eq.s32.totalorder %s25_s26, 0  ;;  %p36_p2 = scmp.eq.s32.totalorder %s1581_s21, 0 }
   0x9   : > { %p41_p3 = scmp.ne.s32.totalorder %s1573_s19, %s1569_s18  ;;  %p42_p4 = scmp.eq.s32.totalorder %s1692_s22, 0 }
   0xa   : > { %s1708_s27 = scalar_select %p26_p1, %s1577_s20, %s28_s25  }
   0xb   : > { %p1710_p5 = por %p36_p2, %p35_p0  ;;  %p1714_p6 = por %p42_p4, %p41_p3 }
   0xc   : > { %p149_p7 = scmp.eq.s32.totalorder %s1692_s22, 1  ;;  %p155_p8 = scmp.eq.s32.totalorder %s1316_s23, 1 }
   0xd   : > { %s2231_s29 = scalar_select %p1714_p6, 1, 0 }
   0xe   : > { %p1392_p10 = scmp.lt.s32.totalorder %s1581_s21, 2  ;;  %p1721_p11 = por %p149_p7, %p35_p0 }
   0xf   : > { %p1725_p12 = por %p155_p8, %p41_p3  ;;  %s187_s7 = sand.u32 1, %s1577_s20  }
  0x10   : > { %s2232_s30 = scalar_select %p1721_p11, 1, 0 }
  0x11   : > { %s2233_s6 = scalar_select %p1725_p12, 1, 0 }
  0x12   : > { %s1340_s8 = sshll.u32 %s1581_s21, 7  ;;  %s1319_s9 = sshll.u32 %s187_s7, 3 }
  0x13   : > { %s1734_s12 = scalar_lea.hbm %s2181_s0, %s1340_s8  ;;  %s191_s13 = scalar_lea.vmem [#allocation3], %s1319_s9 }
  0x14   : > { %s199_s14 = sshll.u32 %s191_s13, 4  ;;  %p1738_p13 = pnand %p1392_p10, %p1710_p5  ;;  %s1742_s14 = int_to_ptr.vmem [resolvable:$true] %s199_s14 }
  0x15   : > { %s188_s16 = scalar_lea.sflag [#allocation4], %s187_s7  ;;  %s1489_s17 = scalar_lea.hbm %s1734_s12, 128 }
  0x16   : > { %p1490_p2 = scmp.ne.s32.totalorder %s1734_s12, %s1489_s17  ;;  %p1491_p3 = pneg %p1738_p13 }
  0x17   : > { %s1494_s26 = scalar_lea.hbm %s2181_s0, 256  ;;  %p1495_p5 = scmp.lt.s32.totalorder %s1734_s12, %s2181_s0 }
  0x18   : > { %p1492_p4 = pnand %p1491_p3, %p1490_p2  ;;  %p1496_p8 = scmp.lt.s32.totalorder %s1494_s26, %s1489_s17 }
  0x1a   : > { %p1493_p7 = pneg %p1492_p4  ;;  %p1497_p10 = por %p1496_p8, %p1495_p5 }
  0x1c   : > { %p1498_p9 = pnand %p1497_p10, %p1493_p7 }
  0x1e   : > { %1501 = shalt.err (!%p1498_p9)
}
  0x1f   : > { %s1502_s7 = scalar_lea.vmem %s1742_s14, 128  ;;  %s1583_s9 = smov [#allocation3]  }
  0x20   : > { %p1503_p0 = scmp.ne.s32.totalorder %s1742_s14, %s1502_s7  ;;  %s1507_s10 = sshll.u32 %s1583_s9, 4  ;;  %s1508_s10 = int_to_ptr.vmem [resolvable:$false] %s1507_s10 }
  0x21   : > { %s1509_s11 = scalar_lea.vmem %s1508_s10, 256  ;;  %p1510_p4 = scmp.lt.s32.totalorder %s1742_s14, %s1508_s10 }
  0x22   : > { %p1505_p1 = pnand %p1503_p0, %p1491_p3  ;;  %p1511_p12 = scmp.lt.s32.totalorder %s1509_s11, %s1502_s7 }
  0x24   : > { %p1506_p2 = pneg %p1505_p1  ;;  %p1512_p11 = por %p1511_p12, %p1510_p4 }
  0x26   : > { %p1513_p6 = pnand %p1512_p11, %p1506_p2 }
  0x28   : > { %1516 = shalt.err (!%p1513_p6)
}
  0x29   : > { %1387 = dma.hbm_to_vmem [thread:$0]  (!%p1738_p13), %s1734_s12, 128, %s1742_s14, %s188_s16  }
  0x2a   : > { %p2235_p9 = scmp.lt.s32.totalorder %s1581_s21, 3  ;;  %p2236_p7 = scmp.ge.s32.totalorder %s1581_s21, 1 }
  0x2c   : > { %p205_p0 = pnand %p2236_p7, %p2235_p9 }
  0x2d   : > { %s1769_s13 = sand.u32 (!%p205_p0), 1, %s1573_s19   ;;  %p2237_p6 = scmp.ne.s32.totalorder (!%p205_p0), %s2231_s29, 0 }
  0x2e   : > { %208 = sbr.rel (%p205_p0) target bundleno = 1473 (0x5c1), region = 40  ;;  %s2189_s17 = sshll.u32 (!%p205_p0), %s1769_s13, 3 }
  0x2f   : > { %s211_s23 = scalar_lea.sflag (!%p205_p0), [#allocation4], %s1769_s13  ;;  %s1775_s15 = scalar_lea.vmem (!%p205_p0), [#allocation3], %s2189_s17 }
  0x33   : > { %1560 = dma.done.wait (%p2237_p6), %s211_s23, 128  }
  0x34   : > { %1562 = vsyncadd (%p2237_p6), %s211_s23, 4294967168  ;;  %v245_v0 = vld [vmem:[%s1775_s15] sm:$0xff]  ;;  %s1584_s12 = smov 1   ;;  %s1585_s14 = smov 97   ;;  %vm241_vm0 = vcmask 142336   ;;  %v1592_v2 = vmov 0.0  }
  0x35   : > { %247 = vrot.lane.b32.xlu0 %v245_v0, %s1584_s12  ;;  %271 = vrot.lane.b32.xlu1 %v245_v0, %s1585_s14  ;;  %s1586_s16 = smov 113   ;;  %s1587_s25 = smov 81   ;;  %v342_v1 = vcombine.high %v245_v0, %v245_v0  ;;  %242 = vst.msk [vmem:[#allocation2] sm:$0xf] %vm241_vm0, %v1592_v2  ;;  %vm250_vm1 = vcmask 7168   ;;  %vm252_vm2 = vcmask 138240  }
  0x36   : > { %s1588_s26 = smov 33   ;;  %s1589_s28 = smov 65   ;;  %1354 = vmatprep.subr.mxu1 %v1592_v2  ;;  %630 = vmatprep.mubr.f32.mxu0 %v1592_v2  ;;  %vm243_vm3 = vcmask 568720   ;;  %vm258_vm4 = vcmask 289936   ;;  %vm269_vm5 = vcmask 437536   ;;  %vm280_vm6 = vcmask 585136  }
  0x37   : > { %s1590_s8 = smov 49   ;;  %s1591_s29 = smov 17   ;;  %244 = vst.msk [vmem:[#allocation2 + $0x8] sm:$0xf] %vm243_vm3, %v1592_v2  ;;  %vm2198_vm7 = vcmask 732736   ;;  %vm327_vm8 = vcmask 1044464  }
  0x38   : > { %s1593_s7 = smov 18   ;;  %s1594_s9 = smov 36   ;;  %vm328_vm9 = vcmask 130052   ;;  %vm2196_vm10 = vcmask 880336   ;;  %vm324_vm11 = vcmask 1031168   ;;  %vm2195_vm12 = vcmask 1027936  }
  0x39   : > { %260 = vrot.lane.b32.xlu0 %v245_v0, %s1586_s16  ;;  %282 = vrot.lane.b32.xlu1 %v245_v0, %s1587_s25  ;;  %s1595_s10 = smov 54   ;;  %s2229_s11 = smov 72   ;;  %vm1842_vm13 = vmor %vm328_vm9, %vm327_vm8  ;;  %vm2197_vm14 = vcmask 273536   ;;  %vm2199_vm15 = vcmask 421136   ;;  %vm363_vm0 = vcmask 568736   ;;  %vm2200_vm3 = vcmask 716336  }
  0x3a   : > { %s1597_s23 = smov 126   ;;  %s2193_s17 = smov 124   ;;  %vm2215_vm8 = vcmask 863936   ;;  %vm410_vm9 = vcmask 1044448  }
  0x3b   : > { %p2277_p12 = scmp.ne.s32.totalorder %s2232_s30, 0 }
  0x3d   : > { %315 = vrot.lane.b32.xlu0 %v245_v0, %s1588_s26  ;;  %293 = vrot.lane.b32.xlu1 %v245_v0, %s1589_s28 }
  0x41   : > { %304 = vrot.lane.b32.xlu0 %v245_v0, %s1590_s8  ;;  %331 = vrot.lane.b32.xlu1 %v245_v0, %s1591_s29 }
  0x45   : > { %343 = vrot.lane.b32.xlu0 %v342_v1, %s1584_s12  ;;  %354 = vrot.lane.b32.xlu1 %v342_v1, %s1586_s16 }
  0x49   : > { %365 = vrot.lane.b32.xlu0 %v342_v1, %s1585_s14  ;;  %398 = vrot.lane.b32.xlu1 %v342_v1, %s1590_s8  ;;  %s2225_s14 = smov 90   ;;  %s2210_s8 = smov 52  }
  0x4d   : > { %376 = vrot.lane.b32.xlu0 %v342_v1, %s1587_s25  ;;  %387 = vrot.lane.b32.xlu1 %v342_v1, %s1589_s28  ;;  %s2227_s25 = smov 108   ;;  %s2192_s28 = smov 34  }
  0x51   : > { %414 = vrot.lane.b32.xlu0 %v342_v1, %s1588_s26  ;;  %425 = vrot.lane.b32.xlu1 %v342_v1, %s1591_s29  ;;  %s2190_s26 = smov 16   ;;  %s2191_s29 = smov 70  }
  0xa7   : > { %v248_v3 = vpop.permute.xlu0 %247  ;;  %v272_v4 = vpop.permute.xlu1 %271 }
  0xa8   : > { %v251_v5 = vsel %vm250_vm1, 0.0, %v248_v3  ;;  %v274_v6 = vsel %vm250_vm1, 0.0, %v272_v4 }
  0xa9   : > { %v253_v7 = vsel %vm252_vm2, %v251_v5, 0.0  ;;  %v275_v9 = vsel %vm252_vm2, %v274_v6, 0.0 }
  0xaa   : > { %255 = vrot.lane.b32.xlu0 %v253_v7, %s1593_s7 }
  0xab   : > { %v261_v8 = vpop.permute.xlu0 %260  ;;  %v283_v10 = vpop.permute.xlu1 %282 }
  0xac   : > { %v263_v11 = vsel %vm250_vm1, 0.0, %v261_v8  ;;  %v285_v12 = vsel %vm250_vm1, 0.0, %v283_v10 }
  0xad   : > { %v264_v13 = vsel %vm252_vm2, %v263_v11, 0.0  ;;  %v286_v15 = vsel %vm252_vm2, %v285_v12, 0.0 }
  0xae   : > { %266 = vrot.lane.b32.xlu1 %v264_v13, %s1594_s9  ;;  %277 = vrot.lane.b32.xlu0 %v275_v9, %s1595_s10 }
  0xaf   : > { %v316_v14 = vpop.permute.xlu0 %315  ;;  %v294_v16 = vpop.permute.xlu1 %293 }
  0xb0   : > { %v318_v17 = vsel %vm250_vm1, 0.0, %v316_v14  ;;  %v296_v18 = vsel %vm250_vm1, 0.0, %v294_v16  ;;  %v437_v16 = vld [vmem:[%s2183_s2] sm:$0xf] }
  0xb1   : > { %v319_v19 = vsel %vm252_vm2, %v318_v17, 0.0  ;;  %v297_v21 = vsel %vm252_vm2, %v296_v18, 0.0 }
  0xb2   : > { %288 = vrot.lane.b32.xlu1 %v286_v15, %s2229_s11  ;;  %321 = vrot.lane.b32.xlu0 %v319_v19, %s1597_s23  ;;  %v1614_v15 = vmov 0   ;;  %s1623_s11 = smov 95  }
  0xb3   : > { %v305_v20 = vpop.permute.xlu0 %304  ;;  %v332_v22 = vpop.permute.xlu1 %331  ;;  %1482 = vset.pattern.permute.xlu0 %v1614_v15 }
  0xb4   : > { %v307_v23 = vsel %vm250_vm1, 0.0, %v305_v20  ;;  %v334_v24 = vsel %vm250_vm1, 0.0, %v332_v22 }
  0xb5   : > { %v308_v25 = vsel %vm252_vm2, %v307_v23, 0.0  ;;  %v335_v26 = vsel %vm252_vm2, %v334_v24, 0.0 }
  0xb6   : > { %299 = vrot.lane.b32.xlu1 %v297_v21, %s2225_s14  ;;  %310 = vrot.lane.b32.xlu0 %v308_v25, %s2227_s25 }
  0xb7   : > { %v344_v27 = vpop.permute.xlu0 %343  ;;  %v355_v28 = vpop.permute.xlu1 %354 }
  0xb8   : > { %v346_v29 = vsel %vm250_vm1, 0.0, %v344_v27  ;;  %v357_v30 = vsel %vm250_vm1, 0.0, %v355_v28 }
  0xb9   : > { %v347_v31 = vsel %vm252_vm2, %v346_v29, 0.0  ;;  %v358_v32 = vsel %vm252_vm2, %v357_v30, 0.0 }
  0xba   : > { %337 = vrot.lane.b32.xlu1 %v335_v26, %s2190_s26  ;;  %349 = vrot.lane.b32.xlu0 %v347_v31, %s2192_s28  ;;  %s2203_s26 = smov 88   ;;  %s2202_s28 = smov 14  }
  0xbb   : > { %v366_v33 = vpop.permute.xlu0 %365  ;;  %v399_v34 = vpop.permute.xlu1 %398 }
  0xbc   : > { %v368_v35 = vsel %vm250_vm1, 0.0, %v366_v33  ;;  %v401_v36 = vsel %vm250_vm1, 0.0, %v399_v34 }
  0xbd   : > { %v369_v37 = vsel %vm252_vm2, %v368_v35, 0.0  ;;  %v402_v38 = vsel %vm252_vm2, %v401_v36, 0.0 }
  0xbe   : > { %360 = vrot.lane.b32.xlu1 %v358_v32, %s2210_s8  ;;  %371 = vrot.lane.b32.xlu0 %v369_v37, %s2191_s29  ;;  %s2204_s29 = smov 106   ;;  %s1617_s8 = smov 21  }
  0xbf   : > { %v377_v39 = vpop.permute.xlu0 %376  ;;  %v388_v40 = vpop.permute.xlu1 %387 }
  0xc0   : > { %v379_v41 = vsel %vm250_vm1, 0.0, %v377_v39  ;;  %v390_v42 = vsel %vm250_vm1, 0.0, %v388_v40 }
  0xc1   : > { %v380_v43 = vsel %vm252_vm2, %v379_v41, 0.0  ;;  %v391_v44 = vsel %vm252_vm2, %v390_v42, 0.0 }
  0xc2   : > { %404 = vrot.lane.b32.xlu1 %v402_v38, %s2193_s17  ;;  %382 = vrot.lane.b32.xlu0 %v380_v43, %s2203_s26  ;;  %s2201_s17 = smov 32   ;;  %s2206_s26 = smov 109  }
  0xc3   : > { %v415_v45 = vpop.permute.xlu0 %414  ;;  %v426_v46 = vpop.permute.xlu1 %425 }
  0xc4   : > { %v417_v47 = vsel %vm250_vm1, 0.0, %v415_v45  ;;  %v428_v48 = vsel %vm250_vm1, 0.0, %v426_v46 }
  0xc5   : > { %v418_v49 = vsel %vm252_vm2, %v417_v47, 0.0  ;;  %v429_v50 = vsel %vm252_vm2, %v428_v48, 0.0 }
  0xc6   : > { %393 = vrot.lane.b32.xlu1 %v391_v44, %s2204_s29  ;;  %420 = vrot.lane.b32.xlu0 %v418_v49, %s2202_s28  ;;  %s2223_s28 = smov 91   ;;  %s2221_s29 = smov 110  }
  0xca   : > { %431 = vrot.lane.b32.xlu1 %v429_v50, %s2201_s17  ;;  %s2208_s17 = smov 92  }
 0x11c   : > { %v256_v51 = vpop.permute.xlu0 %255 }
 0x11d   : > { %259 = vst.msk [vmem:[#allocation2] sm:$0xf] %vm258_vm4, %v256_v51 }
 0x120   : > { %v267_v52 = vpop.permute.xlu1 %266  ;;  %v278_v53 = vpop.permute.xlu0 %277 }
 0x121   : > { %270 = vst.msk [vmem:[#allocation2] sm:$0xf] %vm269_vm5, %v267_v52 }
 0x122   : > { %281 = vst.msk [vmem:[#allocation2] sm:$0xf] %vm280_vm6, %v278_v53 }
 0x124   : > { %v289_v54 = vpop.permute.xlu1 %288  ;;  %v322_v55 = vpop.permute.xlu0 %321 }
 0x125   : > { %292 = vst.msk [vmem:[#allocation2] sm:$0xf] %vm2198_vm7, %v289_v54  ;;  %v323_v56 = vrot.slane %v322_v55, 4 }
 0x127   : > { %v325_v60 = vsel %vm324_vm11, %v323_v56, %v322_v55 }
 0x128   : > { %v300_v57 = vpop.permute.xlu1 %299  ;;  %v311_v58 = vpop.permute.xlu0 %310 }
 0x129   : > { %303 = vst.msk [vmem:[#allocation2] sm:$0xf] %vm2196_vm10, %v300_v57  ;;  %vm2214_vm10 = vcmask 1014784  }
 0x12a   : > { %314 = vst.msk [vmem:[#allocation2] sm:$0xf] %vm2195_vm12, %v311_v58  ;;  %vm411_vm12 = vcmask 113668  }
 0x12b   : > { %330 = vst.msk [vmem:[#allocation2] sm:$0xff] %vm1842_vm13, %v325_v60  ;;  %vm1856_vm7 = vmor %vm411_vm12, %vm410_vm9  ;;  %vm1613_vm12 = vmmov 0   ;;  %vm2216_vm9 = vcmask 736256  }
 0x12c   : > { %v338_v61 = vpop.permute.xlu1 %337  ;;  %v350_v62 = vpop.permute.xlu0 %349  ;;  %1364 = vmatprep.mubr.msk.f32.mxu1 %vm1613_vm12, %v1592_v2 }
 0x12d   : > { %341 = vst.msk [vmem:[#allocation2 + $0x4] sm:$0xf] %vm2197_vm14, %v338_v61  ;;  %vm2213_vm14 = vcmask 1011536  }
 0x12e   : > { %353 = vst.msk [vmem:[#allocation2 + $0x4] sm:$0xf] %vm2199_vm15, %v350_v62  ;;  %vm2212_vm15 = vcmask 257136  }
 0x130   : > { %v361_v63 = vpop.permute.xlu1 %360  ;;  %v372_v0 = vpop.permute.xlu0 %371 }
 0x131   : > { %364 = vst.msk [vmem:[#allocation2 + $0x4] sm:$0xf] %vm363_vm0, %v361_v63 }
 0x132   : > { %375 = vst.msk [vmem:[#allocation2 + $0x4] sm:$0xf] %vm2200_vm3, %v372_v0  ;;  %vm2211_vm3 = vcmask 404736  }
 0x134   : > { %v405_v1 = vpop.permute.xlu1 %404  ;;  %v383_v3 = vpop.permute.xlu0 %382 }
 0x135   : > { %v406_v4 = vrot.slane %v405_v1, 4  ;;  %386 = vst.msk [vmem:[#allocation2 + $0x4] sm:$0xf] %vm2215_vm8, %v383_v3  ;;  %vm2217_vm8 = vcmask 883712  }
 0x137   : > { %v408_v8 = vsel %vm2214_vm10, %v406_v4, %v405_v1  ;;  %vm487_vm10 = vcmask 891904   ;;  %v436_v1 = vld [vmem:[%s2182_s1] sm:$0xf] }
 0x138   : > { %v394_v6 = vpop.permute.xlu1 %393  ;;  %v421_v7 = vpop.permute.xlu0 %420 }
 0x139   : > { %397 = vst.msk [vmem:[#allocation2 + $0x4] sm:$0xf] %vm2213_vm14, %v394_v6  ;;  %vm511_vm14 = vcmask 752640  }
 0x13a   : > { %413 = vst.msk [vmem:[#allocation2 + $0x4] sm:$0xff] %vm1856_vm7, %v408_v8 }
 0x13b   : > { %424 = vst.msk [vmem:[#allocation2 + $0x8] sm:$0xf] %vm2212_vm15, %v421_v7  ;;  %vm523_vm15 = vcmask 744448  }
 0x13c   : > { %v432_v9 = vpop.permute.xlu1 %431 }
 0x13d   : > { %435 = vst.msk [vmem:[#allocation2 + $0x8] sm:$0xf] %vm2211_vm3, %v432_v9  ;;  %vm538_vm3 = vcmask 1043456  }
 0x141   : > { %v1866_v10 = vld [vmem:[#allocation2] sm:$0xff] }
 0x142   : > { %505 = vrot.lane.b32.xlu1 %v1866_v10, %s2208_s17  ;;  %519 = vrot.lane.b32.xlu0 %v1866_v10, %s2223_s28  ;;  %v1878_v11 = vcombine.high %v1866_v10, %v1866_v10  ;;  %v444_v12 = vcombine.low %v1866_v10, %v1866_v10 }
 0x144   : > { %v1893_v13 = vld [vmem:[#allocation2 + $0x8] sm:$0xf] }
 0x145   : > { %v445_v14 = vcombine.low %v1893_v13, %v1893_v13 }
 0x146   : > { %495 = vrot.lane.b32.xlu1 %v1866_v10, %s2227_s25  ;;  %529 = vrot.lane.b32.xlu0 %v1866_v10, %s2225_s14 }
 0x14a   : > { %481 = vrot.lane.b32.xlu1 %v1866_v10, %s2206_s26  ;;  %531 = vrot.lane.b32.xlu0 %v1878_v11, %s2225_s14 }
 0x14e   : > { %471 = vrot.lane.b32.xlu1 %v1866_v10, %s2221_s29  ;;  %507 = vrot.lane.b32.xlu0 %v1878_v11, %s2208_s17 }
 0x152   : > { %458 = vrot.lane.b32.xlu1 %v1866_v10, %s1597_s23  ;;  %517 = vrot.lane.b32.xlu0 %v444_v12, %s2223_s28 }
 0x156   : > { %485 = vrot.lane.b32.xlu0 %v1893_v13, %s2206_s26  ;;  %533 = vrot.lane.b32.xlu1 %v1893_v13, %s2225_s14  ;;  %s1621_s14 = smov 3  }
 0x15a   : > { %493 = vrot.lane.b32.xlu0 %v444_v12, %s2227_s25  ;;  %509 = vrot.lane.b32.xlu1 %v1893_v13, %s2208_s17  ;;  %s1616_s17 = smov 93  }
 0x15e   : > { %462 = vrot.lane.b32.xlu0 %v1893_v13, %s1597_s23  ;;  %483 = vrot.lane.b32.xlu1 %v1878_v11, %s2206_s26  ;;  %s2219_s26 = smov 127  }
 0x162   : > { %469 = vrot.lane.b32.xlu0 %v444_v12, %s2221_s29  ;;  %460 = vrot.lane.b32.xlu1 %v1878_v11, %s1597_s23 }
 0x166   : > { %497 = vrot.lane.b32.xlu0 %v445_v14, %s2227_s25  ;;  %521 = vrot.lane.b32.xlu1 %v445_v14, %s2223_s28  ;;  %s1620_s28 = smov 75   ;;  %s1622_s25 = smov 57  }
 0x16a   : > { %473 = vrot.lane.b32.xlu0 %v445_v14, %s2221_s29  ;;  %448 = vrot.lane.b32.xlu1 %v1866_v10, %s2219_s26  ;;  %s1619_s29 = smov 39  }
 0x16e   : > { %450 = vrot.lane.b32.xlu0 %v445_v14, %s2219_s26  ;;  %446 = vrot.lane.b32.xlu1 %v444_v12, %s2219_s26  ;;  %s1618_s26 = smov 111  }
 0x172   : > { %553 = vperm.xlu0 %1482, %v437_v16  }
 0x1b4   : > { %v506_v17 = vpop.permute.xlu1 %505  ;;  %v520_v18 = vpop.permute.xlu0 %519 }
 0x1b8   : > { %v496_v19 = vpop.permute.xlu1 %495  ;;  %v530_v20 = vpop.permute.xlu0 %529 }
 0x1bc   : > { %v482_v21 = vpop.permute.xlu1 %481  ;;  %v532_v22 = vpop.permute.xlu0 %531 }
 0x1bd   : > { %v536_v30 = vsel %vm2216_vm9, %v530_v20, %v532_v22 }
 0x1c0   : > { %v472_v23 = vpop.permute.xlu1 %471  ;;  %v508_v24 = vpop.permute.xlu0 %507 }
 0x1c1   : > { %v512_v38 = vsel %vm511_vm14, %v506_v17, %v508_v24 }
 0x1c4   : > { %v459_v25 = vpop.permute.xlu1 %458  ;;  %v518_v26 = vpop.permute.xlu0 %517 }
 0x1c5   : > { %v524_v37 = vsel %vm523_vm15, %v518_v26, %v520_v18 }
 0x1c6   : > { %v548_v48 = vsel %vm538_vm3, %v512_v38, %v524_v37 }
 0x1c8   : > { %v486_v27 = vpop.permute.xlu0 %485  ;;  %v534_v28 = vpop.permute.xlu1 %533 }
 0x1c9   : > { %1355 = vmatpush3.msk.msra.mxu1 %vm538_vm3, %v534_v28  ;;  %v537_v29 = vsel %vm2216_vm9, %v532_v22, %v534_v28  ;;  %vm2218_vm9 = vcmask 900096  }
 0x1ca   : > { %1325 = vmatprep.subr.msk.mxu0 %vm538_vm3, %v537_v29  ;;  %1356 = vmatprep.subr.mxu1 %v1592_v2 }
 0x1cb   : > { %1326 = vmatpush1.msk.msra.mxu0 %vm538_vm3, %v536_v30 }
 0x1cc   : > { %v494_v31 = vpop.permute.xlu0 %493  ;;  %v510_v32 = vpop.permute.xlu1 %509 }
 0x1cd   : > { %v513_v42 = vsel %vm511_vm14, %v508_v24, %v510_v32  ;;  %v500_v46 = vsel %vm2217_vm8, %v494_v31, %v496_v19 }
 0x1d0   : > { %v463_v33 = vpop.permute.xlu0 %462  ;;  %v484_v34 = vpop.permute.xlu1 %483 }
 0x1d1   : > { %v488_v39 = vsel %vm487_vm10, %v482_v21, %v484_v34  ;;  %v489_v49 = vsel %vm487_vm10, %v484_v34, %v486_v27 }
 0x1d2   : > { %v545_v51 = vsel %vm538_vm3, %v488_v39, %v500_v46 }
 0x1d4   : > { %v470_v35 = vpop.permute.xlu0 %469  ;;  %v461_v36 = vpop.permute.xlu1 %460 }
 0x1d5   : > { %v476_v52 = vsel %vm2218_vm9, %v470_v35, %v472_v23  ;;  %v464_v53 = vsel %vm324_vm11, %v459_v25, %v461_v36  ;;  %v465_v57 = vsel %vm324_vm11, %v461_v36, %v463_v33 }
 0x1d6   : > { %v542_v62 = vsel %vm538_vm3, %v464_v53, %v476_v52 }
 0x1d8   : > { %v498_v40 = vpop.permute.xlu0 %497  ;;  %v522_v41 = vpop.permute.xlu1 %521 }
 0x1d9   : > { %v501_v43 = vsel %vm2217_vm8, %v496_v19, %v498_v40  ;;  %v525_v44 = vsel %vm523_vm15, %v520_v18, %v522_v41  ;;  %v550_v45 = vsel %vm538_vm3, %v510_v32, %v522_v41  ;;  %v547_v50 = vsel %vm538_vm3, %v486_v27, %v498_v40 }
 0x1da   : > { %1357 = vmatpush3.msra.mxu1 %v550_v45  ;;  %v549_v47 = vsel %vm538_vm3, %v513_v42, %v525_v44  ;;  %v546_v56 = vsel %vm538_vm3, %v489_v49, %v501_v43  ;;  %vm452_vm8 = vcmask 1039360  }
 0x1db   : > { %590 = vmatprep.subr.mxu0 %v549_v47  ;;  %1358 = vmatprep.subr.mxu1 %v1592_v2 }
 0x1dc   : > { %v474_v54 = vpop.permute.xlu0 %473  ;;  %591 = vmatpush1.msra.mxu0 %v548_v48  ;;  %1359 = vmatpush3.msra.mxu1 %v547_v50  ;;  %v449_v55 = vpop.permute.xlu1 %448 }
 0x1dd   : > { %v477_v58 = vsel %vm2218_vm9, %v472_v23, %v474_v54  ;;  %592 = vmatprep.subr.mxu0 %v546_v56  ;;  %1360 = vmatprep.subr.mxu1 %v1592_v2  ;;  %v544_v60 = vsel %vm538_vm3, %v463_v33, %v474_v54  ;;  %vm556_vm9 = vcmask 293888  }
 0x1de   : > { %593 = vmatpush1.msra.mxu0 %v545_v51  ;;  %1361 = vmatpush3.msra.mxu1 %v544_v60  ;;  %v543_v61 = vsel %vm538_vm3, %v465_v57, %v477_v58 }
 0x1df   : > { %594 = vmatprep.subr.mxu0 %v543_v61  ;;  %1362 = vmatprep.subr.mxu1 %v1592_v2 }
 0x1e0   : > { %v451_v63 = vpop.permute.xlu0 %450  ;;  %595 = vmatpush1.msra.mxu0 %v542_v62  ;;  %v447_v0 = vpop.permute.xlu1 %446 }
 0x1e1   : > { %v454_v3 = vsel %vm452_vm8, %v449_v55, %v451_v63  ;;  %v453_v4 = vsel %vm452_vm8, %v447_v0, %v449_v55  ;;  %v541_v6 = vsel %vm538_vm3, %v1893_v13, %v451_v63 }
 0x1e2   : > { %1363 = vmatpush3.msra.mxu1 %v541_v6  ;;  %v540_v7 = vsel %vm538_vm3, %v1878_v11, %v454_v3  ;;  %v539_v8 = vsel %vm538_vm3, %v1866_v10, %v453_v4 }
 0x1e3   : > { %596 = vmatprep.subr.mxu0 %v540_v7  ;;  %1365 = vmatmul.mubr.msk.f32.vlgmr.msra.gmra.mxu1 %vm556_vm9, %v436_v1 }
 0x1e4   : > { %597 = vmatpush1.msra.mxu0 %v539_v8  ;;  %1367 = vmatprep.subr.mxu1 %v1592_v2 }
 0x1e5   : > { %1327 = vmatmul.mubr.msk.f32.vlgmr.msra.gmra.mxu0 %vm556_vm9, %v436_v1  ;;  %1377 = vmatprep.mubr.msk.f32.mxu1 %vm1613_vm12, %v1592_v2  ;;  %vm788_vm12 = vcmask 23552  }
 0x1e6   : > { %1070 = vmatprep.mubr.f32.mxu0 %v1592_v2 }
 0x1ed   : > { %v554_v9 = vpop.permute.xlu0 %553 }
 0x2a3   : > { %v703_v12 = vpop.f32.mrf.mxu1 }
 0x2a4   : > { %v704_v18 = vadd.f32 %v703_v12, %v554_v9 }
 0x2a5   : > { %v632_v13 = vpop.f32.mrf.mxu0  ;;  %v1366_v11 = vpop.f32.mrf.mxu1 }
 0x2a6   : > { %v633_v14 = vadd.f32 %v632_v13, %v554_v9  ;;  %v709_v19 = vmax.f32 %v704_v18, 0.0 }
 0x2a7   : > { %v634_v10 = vpop.f32.mrf.mxu0 }
 0x2a8   : > { %v707_v15 = vmax.f32 %v633_v14, 0.0  ;;  %v635_v16 = vadd.f32 %v634_v10, %v554_v9 }
 0x2aa   : > { %731 = vrot.lane.b32.xlu0 %v707_v15, %s1616_s17  ;;  %711 = vrot.lane.b32.xlu1 %v707_v15, %s1584_s12  ;;  %v708_v17 = vmax.f32 %v635_v16, 0.0  ;;  %s1624_s17 = smov 23   ;;  %s1625_s12 = smov 41  }
 0x2ae   : > { %771 = vrot.lane.b32.xlu0 %v707_v15, %s1617_s8  ;;  %721 = vrot.lane.b32.xlu1 %v707_v15, %s1618_s26  ;;  %s1626_s26 = smov 77   ;;  %s1629_s8 = smov 115  }
 0x2b2   : > { %761 = vrot.lane.b32.xlu0 %v707_v15, %s1619_s29  ;;  %741 = vrot.lane.b32.xlu1 %v707_v15, %s1620_s28  ;;  %s1627_s29 = smov 5   ;;  %s1628_s28 = smov 59  }
 0x2b6   : > { %786 = vrot.lane.b32.xlu0 %v708_v17, %s1621_s14  ;;  %751 = vrot.lane.b32.xlu1 %v707_v15, %s1622_s25  ;;  %s2248_s25 = smov 16  }
 0x2ba   : > { %808 = vrot.lane.b32.xlu0 %v708_v17, %s1623_s11  ;;  %784 = vrot.lane.b32.xlu1 %v707_v15, %s1621_s14  ;;  %s2246_s11 = smov 124   ;;  %s2247_s14 = smov 34  }
 0x2be   : > { %848 = vrot.lane.b32.xlu0 %v708_v17, %s1624_s17  ;;  %798 = vrot.lane.b32.xlu1 %v708_v17, %s1586_s16  ;;  %s2242_s16 = smov 72   ;;  %s2249_s17 = smov 70  }
 0x2c2   : > { %838 = vrot.lane.b32.xlu0 %v708_v17, %s1625_s12  ;;  %818 = vrot.lane.b32.xlu1 %v708_v17, %s1626_s26  ;;  %s2250_s12 = smov 106   ;;  %s2251_s26 = smov 88  }
 0x2c6   : > { %863 = vrot.lane.b32.xlu0 %v709_v19, %s1627_s29  ;;  %828 = vrot.lane.b32.xlu1 %v708_v17, %s1628_s28  ;;  %s2253_s28 = smov 32  }
 0x2ca   : > { %861 = vrot.lane.b32.xlu1 %v708_v17, %s1627_s29  ;;  %s2252_s29 = smov 14  }
 0x2ce   : > { %875 = vrot.lane.b32.xlu1 %v709_v19, %s1629_s8  ;;  %s2265_s8 = smov 92  }
 0x31c   : > { %v732_v20 = vpop.permute.xlu0 %731  ;;  %v712_v21 = vpop.permute.xlu1 %711 }
 0x31d   : > { %v714_v22 = vsel %vm250_vm1, 0.0, %v712_v21  ;;  %v734_v24 = vsel %vm250_vm1, 0.0, %v732_v20 }
 0x31e   : > { %v715_v23 = vsel %vm252_vm2, %v714_v22, 0.0  ;;  %v735_v28 = vsel %vm252_vm2, %v734_v24, 0.0 }
 0x31f   : > { %717 = vrot.lane.b32.xlu0 %v715_v23, %s1593_s7  ;;  %s2243_s7 = smov 108  }
 0x320   : > { %v772_v25 = vpop.permute.xlu0 %771  ;;  %v722_v26 = vpop.permute.xlu1 %721 }
 0x321   : > { %v724_v27 = vsel %vm250_vm1, 0.0, %v722_v26  ;;  %v774_v30 = vsel %vm250_vm1, 0.0, %v772_v25 }
 0x322   : > { %v725_v29 = vsel %vm252_vm2, %v724_v27, 0.0  ;;  %v775_v34 = vsel %vm252_vm2, %v774_v30, 0.0 }
 0x323   : > { %737 = vrot.lane.b32.xlu0 %v735_v28, %s1595_s10  ;;  %727 = vrot.lane.b32.xlu1 %v725_v29, %s1594_s9  ;;  %s2244_s9 = smov 90   ;;  %s2245_s10 = smov 52  }
 0x324   : > { %v762_v31 = vpop.permute.xlu0 %761  ;;  %v742_v32 = vpop.permute.xlu1 %741 }
 0x325   : > { %v744_v33 = vsel %vm250_vm1, 0.0, %v742_v32  ;;  %v764_v36 = vsel %vm250_vm1, 0.0, %v762_v31 }
 0x326   : > { %v745_v35 = vsel %vm252_vm2, %v744_v33, 0.0  ;;  %v765_v40 = vsel %vm252_vm2, %v764_v36, 0.0 }
 0x327   : > { %777 = vrot.lane.b32.xlu0 %v775_v34, %s1597_s23  ;;  %747 = vrot.lane.b32.xlu1 %v745_v35, %s2242_s16  ;;  %s2266_s16 = smov 91   ;;  %v886_v34 = vld [vmem:[%s2185_s4] sm:$0xf] }
 0x328   : > { %v787_v37 = vpop.permute.xlu0 %786  ;;  %v752_v38 = vpop.permute.xlu1 %751 }
 0x329   : > { %v754_v39 = vsel %vm250_vm1, 0.0, %v752_v38 }
 0x32a   : > { %v755_v41 = vsel %vm252_vm2, %v754_v39, 0.0 }
 0x32b   : > { %767 = vrot.lane.b32.xlu0 %v765_v40, %s2243_s7  ;;  %757 = vrot.lane.b32.xlu1 %v755_v41, %s2244_s9 }
 0x32c   : > { %v809_v42 = vpop.permute.xlu0 %808  ;;  %v785_v43 = vpop.permute.xlu1 %784 }
 0x32d   : > { %v811_v44 = vsel %vm250_vm1, 0.0, %v809_v42  ;;  %v789_v46 = vsel %vm788_vm12, %v785_v43, %v787_v37  ;;  %vm865_vm12 = vcmask 39936  }
 0x32e   : > { %v812_v45 = vsel %vm252_vm2, %v811_v44, 0.0  ;;  %v791_v53 = vsel %vm250_vm1, 0.0, %v789_v46 }
 0x32f   : > { %814 = vrot.lane.b32.xlu1 %v812_v45, %s2245_s10  ;;  %v792_v58 = vsel %vm252_vm2, %v791_v53, 0.0  ;;  %s2267_s10 = smov 109  }
 0x330   : > { %v849_v47 = vpop.permute.xlu0 %848  ;;  %v799_v48 = vpop.permute.xlu1 %798 }
 0x331   : > { %v851_v49 = vsel %vm250_vm1, 0.0, %v849_v47  ;;  %v801_v50 = vsel %vm250_vm1, 0.0, %v799_v48 }
 0x332   : > { %v852_v51 = vsel %vm252_vm2, %v851_v49, 0.0  ;;  %v802_v52 = vsel %vm252_vm2, %v801_v50, 0.0 }
 0x333   : > { %854 = vrot.lane.b32.xlu1 %v852_v51, %s2246_s11  ;;  %804 = vrot.lane.b32.xlu0 %v802_v52, %s2247_s14  ;;  %s2268_s14 = smov 110  }
 0x334   : > { %v839_v54 = vpop.permute.xlu0 %838  ;;  %v819_v55 = vpop.permute.xlu1 %818 }
 0x335   : > { %v821_v56 = vsel %vm250_vm1, 0.0, %v819_v55  ;;  %v841_v60 = vsel %vm250_vm1, 0.0, %v839_v54 }
 0x336   : > { %v822_v57 = vsel %vm252_vm2, %v821_v56, 0.0  ;;  %v842_v63 = vsel %vm252_vm2, %v841_v60, 0.0 }
 0x337   : > { %794 = vrot.lane.b32.xlu1 %v792_v58, %s2248_s25  ;;  %824 = vrot.lane.b32.xlu0 %v822_v57, %s2249_s17  ;;  %s1635_s25 = smov 116   ;;  %s1638_s17 = smov 102  }
 0x338   : > { %v829_v61 = vpop.permute.xlu1 %828  ;;  %v864_v1 = vpop.permute.xlu0 %863 }
 0x339   : > { %v831_v62 = vsel %vm250_vm1, 0.0, %v829_v61 }
 0x33a   : > { %v832_v0 = vsel %vm252_vm2, %v831_v62, 0.0 }
 0x33b   : > { %844 = vrot.lane.b32.xlu1 %v842_v63, %s2250_s12  ;;  %834 = vrot.lane.b32.xlu0 %v832_v0, %s2251_s26  ;;  %s1639_s26 = smov 98  }
 0x33c   : > { %v862_v3 = vpop.permute.xlu1 %861 }
 0x33d   : > { %v866_v4 = vsel %vm865_vm12, %v862_v3, %v864_v1  ;;  %vm2254_vm12 = vcmask 732736  }
 0x33e   : > { %v868_v6 = vsel %vm250_vm1, 0.0, %v866_v4 }
 0x33f   : > { %v869_v7 = vsel %vm252_vm2, %v868_v6, 0.0 }
 0x340   : > { %871 = vrot.lane.b32.xlu0 %v869_v7, %s2252_s29  ;;  %v876_v8 = vpop.permute.xlu1 %875 }
 0x341   : > { %v878_v9 = vsel %vm250_vm1, 0.0, %v876_v8  ;;  %vm2255_vm1 = vcmask 880336  }
 0x342   : > { %v879_v12 = vsel %vm252_vm2, %v878_v9, 0.0  ;;  %vm2256_vm2 = vcmask 1027936  }
 0x343   : > { %881 = vrot.lane.b32.xlu1 %v879_v12, %s2253_s28  ;;  %s1630_s28 = smov 100  }
 0x391   : > { %v718_v13 = vpop.permute.xlu0 %717 }
 0x392   : > { %720 = vst.msk [vmem:[#allocation2] sm:$0xf] %vm258_vm4, %v718_v13  ;;  %vm2257_vm4 = vcmask 273536  }
 0x395   : > { %v738_v11 = vpop.permute.xlu0 %737  ;;  %v728_v14 = vpop.permute.xlu1 %727 }
 0x396   : > { %730 = vst.msk [vmem:[#allocation2] sm:$0xf] %vm269_vm5, %v728_v14  ;;  %vm2258_vm5 = vcmask 421136  }
 0x397   : > { %740 = vst.msk [vmem:[#allocation2] sm:$0xf] %vm280_vm6, %v738_v11  ;;  %vm2259_vm6 = vcmask 716336  }
 0x399   : > { %v778_v15 = vpop.permute.xlu0 %777  ;;  %v748_v10 = vpop.permute.xlu1 %747 }
 0x39a   : > { %750 = vst.msk [vmem:[#allocation2] sm:$0xf] %vm2254_vm12, %v748_v10  ;;  %v779_v16 = vrot.slane %v778_v15, 4  ;;  %vm2260_vm12 = vcmask 863936  }
 0x39c   : > { %v780_v19 = vsel %vm324_vm11, %v779_v16, %v778_v15 }
 0x39d   : > { %v768_v17 = vpop.permute.xlu0 %767  ;;  %v758_v18 = vpop.permute.xlu1 %757 }
 0x39e   : > { %760 = vst.msk [vmem:[#allocation2] sm:$0xf] %vm2255_vm1, %v758_v18  ;;  %vm2261_vm1 = vcmask 1014784  }
 0x39f   : > { %770 = vst.msk [vmem:[#allocation2] sm:$0xf] %vm2256_vm2, %v768_v17  ;;  %vm2263_vm2 = vcmask 257136  }
 0x3a0   : > { %782 = vst.msk [vmem:[#allocation2] sm:$0xff] %vm1842_vm13, %v780_v19  ;;  %vm2262_vm13 = vcmask 1011536  }
 0x3a1   : > { %v815_v20 = vpop.permute.xlu1 %814 }
 0x3a5   : > { %v805_v21 = vpop.permute.xlu0 %804  ;;  %v855_v22 = vpop.permute.xlu1 %854 }
 0x3a6   : > { %v856_v25 = vrot.slane %v855_v22, 4 }
 0x3a8   : > { %v857_v59 = vsel %vm2261_vm1, %v856_v25, %v855_v22  ;;  %vm1197_vm1 = vcmask 818176  }
 0x3a9   : > { %v825_v23 = vpop.permute.xlu0 %824  ;;  %v795_v24 = vpop.permute.xlu1 %794 }
 0x3aa   : > { %797 = vst.msk [vmem:[#allocation2 + $0x4] sm:$0xf] %vm2257_vm4, %v795_v24  ;;  %vm2264_vm4 = vcmask 404736  }
 0x3ab   : > { %807 = vst.msk [vmem:[#allocation2 + $0x4] sm:$0xf] %vm2258_vm5, %v805_v21  ;;  %vm2272_vm5 = vcmask 883712   ;;  %v885_v21 = vld [vmem:[%s2184_s3] sm:$0xf] }
 0x3ac   : > { %817 = vst.msk [vmem:[#allocation2 + $0x4] sm:$0xf] %vm363_vm0, %v815_v20 }
 0x3ad   : > { %v835_v26 = vpop.permute.xlu0 %834  ;;  %827 = vst.msk [vmem:[#allocation2 + $0x4] sm:$0xf] %vm2259_vm6, %v825_v23  ;;  %v845_v27 = vpop.permute.xlu1 %844  ;;  %vm2273_vm6 = vmmov %vm2272_vm5 }
 0x3ae   : > { %837 = vst.msk [vmem:[#allocation2 + $0x4] sm:$0xf] %vm2260_vm12, %v835_v26  ;;  %vm1213_vm12 = vcmask 785408  }
 0x3af   : > { %847 = vst.msk [vmem:[#allocation2 + $0x4] sm:$0xf] %vm2262_vm13, %v845_v27  ;;  %vm1171_vm13 = vcmask 932864  }
 0x3b0   : > { %859 = vst.msk [vmem:[#allocation2 + $0x4] sm:$0xff] %vm1856_vm7, %v857_v59  ;;  %vm2270_vm7 = vcmask 736256  }
 0x3b1   : > { %vm2271_vm0 = vmmov %vm2270_vm7 }
 0x3b2   : > { %v872_v28 = vpop.permute.xlu0 %871 }
 0x3b3   : > { %874 = vst.msk [vmem:[#allocation2 + $0x8] sm:$0xf] %vm2263_vm2, %v872_v28  ;;  %vm1215_vm2 = vcmask 916480  }
 0x3b5   : > { %v882_v29 = vpop.permute.xlu1 %881 }
 0x3b6   : > { %884 = vst.msk [vmem:[#allocation2 + $0x8] sm:$0xf] %vm2264_vm4, %v882_v29 }
 0x3b7   : > { %v2040_v30 = vld [vmem:[#allocation2] sm:$0xff] }
 0x3b8   : > { %950 = vrot.lane.b32.xlu1 %v2040_v30, %s2265_s8  ;;  %963 = vrot.lane.b32.xlu0 %v2040_v30, %s2266_s16  ;;  %v2052_v5 = vcombine.high %v2040_v30, %v2040_v30  ;;  %v893_v31 = vcombine.low %v2040_v30, %v2040_v30 }
 0x3bc   : > { %941 = vrot.lane.b32.xlu1 %v2040_v30, %s2243_s7  ;;  %972 = vrot.lane.b32.xlu0 %v2040_v30, %s2244_s9 }
 0x3bd   : > { %v2067_v32 = vld [vmem:[#allocation2 + $0x8] sm:$0xf] }
 0x3be   : > { %v894_v33 = vcombine.low %v2067_v32, %v2067_v32 }
 0x3c0   : > { %928 = vrot.lane.b32.xlu1 %v2040_v30, %s2267_s10  ;;  %974 = vrot.lane.b32.xlu0 %v2052_v5, %s2244_s9 }
 0x3c4   : > { %919 = vrot.lane.b32.xlu1 %v2040_v30, %s2268_s14  ;;  %952 = vrot.lane.b32.xlu0 %v2052_v5, %s2265_s8 }
 0x3c8   : > { %906 = vrot.lane.b32.xlu1 %v2040_v30, %s1597_s23  ;;  %961 = vrot.lane.b32.xlu0 %v893_v31, %s2266_s16 }
 0x3cc   : > { %932 = vrot.lane.b32.xlu0 %v2067_v32, %s2267_s10  ;;  %976 = vrot.lane.b32.xlu1 %v2067_v32, %s2244_s9  ;;  %s2269_s9 = smov 127  }
 0x3d0   : > { %939 = vrot.lane.b32.xlu0 %v893_v31, %s2243_s7  ;;  %954 = vrot.lane.b32.xlu1 %v2067_v32, %s2265_s8  ;;  %s1631_s8 = smov 122  }
 0x3d4   : > { %910 = vrot.lane.b32.xlu0 %v2067_v32, %s1597_s23  ;;  %930 = vrot.lane.b32.xlu1 %v2052_v5, %s2267_s10  ;;  %s1633_s10 = smov 120  }
 0x3d8   : > { %917 = vrot.lane.b32.xlu0 %v893_v31, %s2268_s14  ;;  %908 = vrot.lane.b32.xlu1 %v2052_v5, %s1597_s23 }
 0x3dc   : > { %943 = vrot.lane.b32.xlu0 %v894_v33, %s2243_s7  ;;  %965 = vrot.lane.b32.xlu1 %v894_v33, %s2266_s16  ;;  %s1632_s16 = smov 114  }
 0x3e0   : > { %921 = vrot.lane.b32.xlu0 %v894_v33, %s2268_s14  ;;  %897 = vrot.lane.b32.xlu1 %v2040_v30, %s2269_s9 }
 0x3e4   : > { %899 = vrot.lane.b32.xlu0 %v894_v33, %s2269_s9  ;;  %895 = vrot.lane.b32.xlu1 %v893_v31, %s2269_s9  ;;  %s1634_s9 = smov 118  }
 0x3e8   : > { %994 = vperm.xlu0 %1482, %v886_v34  }
 0x42a   : > { %v964_v35 = vpop.permute.xlu0 %963  ;;  %v951_v36 = vpop.permute.xlu1 %950 }
 0x42e   : > { %v973_v37 = vpop.permute.xlu0 %972  ;;  %v942_v38 = vpop.permute.xlu1 %941 }
 0x432   : > { %v975_v39 = vpop.permute.xlu0 %974  ;;  %v929_v40 = vpop.permute.xlu1 %928 }
 0x433   : > { %v978_v48 = vsel %vm2271_vm0, %v973_v37, %v975_v39 }
 0x436   : > { %v953_v41 = vpop.permute.xlu0 %952  ;;  %v920_v42 = vpop.permute.xlu1 %919 }
 0x437   : > { %v956_v56 = vsel %vm511_vm14, %v951_v36, %v953_v41 }
 0x43a   : > { %v962_v43 = vpop.permute.xlu0 %961  ;;  %v907_v44 = vpop.permute.xlu1 %906 }
 0x43b   : > { %v967_v55 = vsel %vm523_vm15, %v962_v43, %v964_v35 }
 0x43c   : > { %v989_v4 = vsel %vm538_vm3, %v956_v56, %v967_v55 }
 0x43e   : > { %v933_v45 = vpop.permute.xlu0 %932  ;;  %v977_v46 = vpop.permute.xlu1 %976 }
 0x43f   : > { %v979_v47 = vsel %vm2270_vm7, %v975_v39, %v977_v46  ;;  %1368 = vmatpush3.msk.msra.mxu1 %vm538_vm3, %v977_v46 }
 0x440   : > { %1330 = vmatprep.subr.msk.mxu0 %vm538_vm3, %v979_v47  ;;  %1369 = vmatprep.subr.mxu1 %v1592_v2 }
 0x441   : > { %1331 = vmatpush1.msk.msra.mxu0 %vm538_vm3, %v978_v48 }
 0x442   : > { %v940_v49 = vpop.permute.xlu0 %939  ;;  %v955_v50 = vpop.permute.xlu1 %954 }
 0x443   : > { %v957_v61 = vsel %vm511_vm14, %v953_v41, %v955_v50  ;;  %v945_v1 = vsel %vm2273_vm6, %v940_v49, %v942_v38  ;;  %vm2274_vm14 = vcmask 900096  }
 0x446   : > { %v911_v51 = vpop.permute.xlu0 %910  ;;  %v931_v52 = vpop.permute.xlu1 %930 }
 0x447   : > { %v934_v57 = vsel %vm487_vm10, %v929_v40, %v931_v52  ;;  %v935_v6 = vsel %vm487_vm10, %v931_v52, %v933_v45  ;;  %vm2275_vm10 = vmmov %vm2274_vm14 }
 0x448   : > { %v986_v8 = vsel %vm538_vm3, %v934_v57, %v945_v1  ;;  %v1224_v1 = vld [vmem:[%s1775_s15] sm:$0xff]  ;;  %s1640_s15 = smov [#allocation6]  }
 0x44a   : > { %v918_v53 = vpop.permute.xlu0 %917  ;;  %v909_v54 = vpop.permute.xlu1 %908 }
 0x44b   : > { %v923_v9 = vsel %vm2274_vm14, %v918_v53, %v920_v42  ;;  %v912_v12 = vsel %vm324_vm11, %v907_v44, %v909_v54  ;;  %v913_v15 = vsel %vm324_vm11, %v909_v54, %v911_v51  ;;  %vm1203_vm11 = vcmask 130048  }
 0x44c   : > { %v983_v18 = vsel %vm538_vm3, %v912_v12, %v923_v9 }
 0x44e   : > { %v944_v58 = vpop.permute.xlu0 %943  ;;  %v966_v60 = vpop.permute.xlu1 %965 }
 0x44f   : > { %v946_v62 = vsel %vm2272_vm5, %v942_v38, %v944_v58  ;;  %v968_v63 = vsel %vm523_vm15, %v964_v35, %v966_v60  ;;  %v991_v0 = vsel %vm538_vm3, %v955_v50, %v966_v60  ;;  %v988_v7 = vsel %vm538_vm3, %v933_v45, %v944_v58 }
 0x450   : > { %1370 = vmatpush3.msra.mxu1 %v991_v0  ;;  %v990_v3 = vsel %vm538_vm3, %v957_v61, %v968_v63  ;;  %v987_v14 = vsel %vm538_vm3, %v935_v6, %v946_v62  ;;  %vm1205_vm15 = vcmask 261120  }
 0x451   : > { %1030 = vmatprep.subr.mxu0 %v990_v3  ;;  %1371 = vmatprep.subr.mxu1 %v1592_v2 }
 0x452   : > { %v922_v13 = vpop.permute.xlu0 %921  ;;  %1031 = vmatpush1.msra.mxu0 %v989_v4  ;;  %1372 = vmatpush3.msra.mxu1 %v988_v7  ;;  %v898_v11 = vpop.permute.xlu1 %897 }
 0x453   : > { %v924_v10 = vsel %vm2275_vm10, %v920_v42, %v922_v13  ;;  %v985_v16 = vsel %vm538_vm3, %v911_v51, %v922_v13  ;;  %1032 = vmatprep.subr.mxu0 %v987_v14  ;;  %1373 = vmatprep.subr.mxu1 %v1592_v2 }
 0x454   : > { %1033 = vmatpush1.msra.mxu0 %v986_v8  ;;  %1374 = vmatpush3.msra.mxu1 %v985_v16  ;;  %v984_v17 = vsel %vm538_vm3, %v913_v15, %v924_v10 }
 0x455   : > { %1034 = vmatprep.subr.mxu0 %v984_v17  ;;  %1375 = vmatprep.subr.mxu1 %v1592_v2 }
 0x456   : > { %v900_v19 = vpop.permute.xlu0 %899  ;;  %1035 = vmatpush1.msra.mxu0 %v983_v18  ;;  %v896_v20 = vpop.permute.xlu1 %895 }
 0x457   : > { %v902_v22 = vsel %vm452_vm8, %v898_v11, %v900_v19  ;;  %v982_v23 = vsel %vm538_vm3, %v2067_v32, %v900_v19  ;;  %v901_v24 = vsel %vm452_vm8, %v896_v20, %v898_v11  ;;  %vm1209_vm8 = vcmask 523264  }
 0x458   : > { %1376 = vmatpush3.msra.mxu1 %v982_v23  ;;  %v981_v25 = vsel %vm538_vm3, %v2052_v5, %v902_v22  ;;  %v980_v2 = vsel %vm538_vm3, %v2040_v30, %v901_v24  ;;  %vm1207_vm3 = vcmask 392192  }
 0x459   : > { %1036 = vmatprep.subr.mxu0 %v981_v25  ;;  %1378 = vmatmul.mubr.msk.f32.vlgmr.msra.gmra.mxu1 %vm556_vm9, %v885_v21 }
 0x45a   : > { %1037 = vmatpush1.msra.mxu0 %v980_v2 }
 0x45b   : > { %1332 = vmatmul.mubr.msk.f32.vlgmr.msra.gmra.mxu0 %vm556_vm9, %v885_v21  ;;  %vm1211_vm9 = vcmask 654336  }
 0x463   : > { %v995_v26 = vpop.permute.xlu0 %994 }
 0x519   : > { %v1143_v27 = vpop.f32.mrf.mxu1 }
 0x51a   : > { %v1144_v59 = vadd.f32 %v1143_v27, %v995_v26 }
 0x51b   : > { %v1072_v28 = vpop.f32.mrf.mxu0  ;;  %v1379_v29 = vpop.f32.mrf.mxu1 }
 0x51c   : > { %v1073_v31 = vadd.f32 %v1072_v28, %v995_v26  ;;  %1195 = vrot.lane.b32.xlu1 %v1144_v59, %s1630_s28 }
 0x51d   : > { %v1074_v30 = vpop.f32.mrf.mxu0 }
 0x51e   : > { %1151 = vrot.lane.b32.xlu0 %v1073_v31, %s2246_s11  ;;  %v1075_v5 = vadd.f32 %v1074_v30, %v995_v26  ;;  %s1636_s11 = smov 112  }
 0x520   : > { %1148 = vrot.lane.b32.xlu1 %v1073_v31, %s1597_s23  ;;  %s1637_s23 = smov 104  }
 0x522   : > { %1154 = vrot.lane.b32.xlu0 %v1073_v31, %s1631_s8 }
 0x524   : > { %1167 = vrot.lane.b32.xlu1 %v1073_v31, %s1632_s16 }
 0x526   : > { %1157 = vrot.lane.b32.xlu0 %v1073_v31, %s1633_s10  ;;  %s1232_s10 = scalar_lea.sflag [#allocation5], %s1769_s13 }
 0x528   : > { %1177 = vrot.lane.b32.xlu1 %v1075_v5, %s2268_s14 }
 0x52a   : > { %1160 = vrot.lane.b32.xlu0 %v1073_v31, %s1634_s9 }
 0x52c   : > { %1180 = vrot.lane.b32.xlu1 %v1075_v5, %s2243_s7  ;;  %s1341_s7 = sshll.u32 %s1692_s22, 7 }
 0x52e   : > { %1163 = vrot.lane.b32.xlu0 %v1073_v31, %s1635_s25  ;;  %s1521_s25 = sshll.u32 %s1640_s15, 4  ;;  %s1522_s25 = int_to_ptr.vmem [resolvable:$false] %s1521_s25 }
 0x52f   : > { %s1523_s22 = scalar_lea.vmem %s1522_s25, 256 }
 0x530   : > { %1183 = vrot.lane.b32.xlu1 %v1075_v5, %s2250_s12  ;;  %s2276_s12 = sshll.u32 %s1769_s13, 3 }
 0x531   : > { %s240_s14 = scalar_lea.vmem [#allocation6], %s2276_s12 }
 0x532   : > { %1174 = vrot.lane.b32.xlu0 %v1075_v5, %s1636_s11  ;;  %s1246_s29 = sshll.u32 %s240_s14, 4  ;;  %s1247_s29 = int_to_ptr.vmem [resolvable:$true] %s1246_s29 }
 0x533   : > { %s1517_s9 = scalar_lea.vmem %s1247_s29, 128  ;;  %p1524_p3 = scmp.lt.s32.totalorder %s1247_s29, %s1522_s25 }
 0x534   : > { %1186 = vrot.lane.b32.xlu1 %v1075_v5, %s1637_s23  ;;  %p1518_p11 = scmp.ne.s32.totalorder %s1247_s29, %s1517_s9  ;;  %p1525_p5 = scmp.lt.s32.totalorder %s1523_s22, %s1517_s9 }
 0x536   : > { %1193 = vrot.lane.b32.xlu0 %v1075_v5, %s1630_s28  ;;  %p1519_p13 = pnand %p1518_p11, %p2277_p12  ;;  %p1526_p8 = por %p1525_p5, %p1524_p3 }
 0x538   : > { %1189 = vrot.lane.b32.xlu1 %v1075_v5, %s1638_s17  ;;  %p1520_p1 = pneg %p1519_p13 }
 0x53a   : > { %1169 = vrot.lane.b32.xlu0 %v1075_v5, %s1632_s16  ;;  %s1244_s16 = scalar_lea.hbm %s2186_s5, %s1341_s7  ;;  %p1527_p10 = pnand %p1526_p8, %p1520_p1 }
 0x53c   : > { %1200 = vrot.lane.b32.xlu1 %v1144_v59, %s1639_s26 }
 0x58e   : > { %v1196_v32 = vpop.permute.xlu1 %1195 }
 0x590   : > { %v1152_v33 = vpop.permute.xlu0 %1151 }
 0x592   : > { %v1149_v34 = vpop.permute.xlu1 %1148 }
 0x593   : > { %v1204_v43 = vsel %vm1203_vm11, %v1073_v31, %v1149_v34 }
 0x594   : > { %v1155_v35 = vpop.permute.xlu0 %1154  ;;  %v1206_v48 = vsel %vm1205_vm15, %v1204_v43, %v1152_v33 }
 0x595   : > { %v1208_v51 = vsel %vm1207_vm3, %v1206_v48, %v1155_v35 }
 0x596   : > { %v1168_v36 = vpop.permute.xlu1 %1167 }
 0x598   : > { %v1158_v37 = vpop.permute.xlu0 %1157 }
 0x599   : > { %v1210_v54 = vsel %vm1209_vm8, %v1208_v51, %v1158_v37 }
 0x59a   : > { %v1178_v38 = vpop.permute.xlu1 %1177 }
 0x59c   : > { %v1161_v39 = vpop.permute.xlu0 %1160 }
 0x59d   : > { %v1212_v56 = vsel %vm1211_vm9, %v1210_v54, %v1161_v39 }
 0x59e   : > { %v1181_v40 = vpop.permute.xlu1 %1180 }
 0x5a0   : > { %v1164_v41 = vpop.permute.xlu0 %1163 }
 0x5a1   : > { %v1214_v58 = vsel %vm1213_vm12, %v1212_v56, %v1164_v41 }
 0x5a2   : > { %v1184_v42 = vpop.permute.xlu1 %1183 }
 0x5a4   : > { %v1175_v44 = vpop.permute.xlu0 %1174 }
 0x5a5   : > { %v1217_v45 = vsel %vm1203_vm11, %v1175_v44, %v1178_v38 }
 0x5a6   : > { %v1218_v46 = vsel %vm1205_vm15, %v1217_v45, %v1181_v40  ;;  %v1187_v47 = vpop.permute.xlu1 %1186 }
 0x5a7   : > { %v1219_v49 = vsel %vm1207_vm3, %v1218_v46, %v1184_v42 }
 0x5a8   : > { %v1194_v50 = vpop.permute.xlu0 %1193  ;;  %v1220_v52 = vsel %vm1209_vm8, %v1219_v49, %v1187_v47 }
 0x5a9   : > { %v1198_v60 = vsel %vm1197_vm1, %v1194_v50, %v1196_v32 }
 0x5aa   : > { %v1190_v53 = vpop.permute.xlu1 %1189 }
 0x5ab   : > { %v1221_v55 = vsel %vm1211_vm9, %v1220_v52, %v1190_v53 }
 0x5ac   : > { %v1170_v57 = vpop.permute.xlu0 %1169  ;;  %v1222_v63 = vsel %vm1213_vm12, %v1221_v55, %v1198_v60 }
 0x5ad   : > { %v1172_v61 = vsel %vm1171_vm13, %v1168_v36, %v1170_v57 }
 0x5ae   : > { %v1216_v62 = vsel %vm1215_vm2, %v1214_v58, %v1172_v61  ;;  %v1201_v0 = vpop.permute.xlu1 %1200 }
 0x5af   : > { %v1223_v3 = vsel %vm1215_vm2, %v1222_v63, %v1201_v0 }
 0x5b0   : > { %v1227_v4 = vcombine.low %v1216_v62, %v1223_v3 }
 0x5b2   : > { %v1229_v6 = vadd.f32 %v1227_v4, %v1224_v1 }
 0x5b4   : > { %1230 = vst [vmem:[%s240_s14] sm:$0xff] %v1229_v6 }
 0x5b5   : > { %1530 = shalt.err (!%p1527_p10)
}
 0x5b6   : > { %s1531_s11 = scalar_lea.hbm %s1244_s16, 128  ;;  %s1535_s17 = scalar_lea.hbm %s2186_s5, 256 }
 0x5b7   : > { %p1532_p2 = scmp.ne.s32.totalorder %s1244_s16, %s1531_s11  ;;  %p1536_p7 = scmp.lt.s32.totalorder %s1244_s16, %s2186_s5 }
 0x5b8   : > { %p1537_p0 = scmp.lt.s32.totalorder %s1535_s17, %s1531_s11 }
 0x5b9   : > { %p1533_p4 = pnand %p1532_p2, %p2277_p12 }
 0x5ba   : > { %p1538_p6 = por %p1537_p0, %p1536_p7 }
 0x5bb   : > { %p1534_p9 = pneg %p1533_p4 }
 0x5bd   : > { %p1539_p11 = pnand %p1538_p6, %p1534_p9 }
 0x5bf   : > { %1542 = shalt.err (!%p1539_p11)
}
 0x5c0   : > { %1382 = dma.vmem_to_hbm [thread:$0]  (%p2277_p12), %s1247_s29, 128, %s1244_s16, %s1232_s10  }
 0x5c1 PF: > { %s1258_s12 = sand.u32 1, %s1569_s18   ;;  %p2278_p13 = scmp.ne.s32.totalorder %s2233_s6, 0 }
 0x5c2   : > { %p2279_p1 = scmp.ge.s32.totalorder %s1581_s21, 2  ;;  %s1259_s14 = scalar_lea.sflag [#allocation5], %s1258_s12 }
 0x5c4   : > { %p1389_p3 = pnand %p2279_p1, %p2278_p13 }
 0x5c6   : > { %p1390_p5 = pneg %p1389_p3 }
 0x5c8   : > { %1564 = dma.done.wait (%p1390_p5), %s1259_s14, 128  }
 0x5c9   : > { %1566 = vsyncadd (%p1390_p5), %s1259_s14, 4294967168  ;;  %p18_p8 = scmp.ge.s32.totalorder %s1696_s24, 4   ;;  %s2280_s18 = smov %s1573_s19 }
 0x5ca   : > { %s2281_s19 = smov %s1577_s20  ;;  %s2282_s20 = smov %s1708_s27 }
 0x5cb   : > { %s2283_s21 = smov %s1696_s24  ;;  %20 = sbr.rel (!%p18_p8) target bundleno = 5 (0x5), region = 85 }
 0x5d0   :  { %1264 = vsyncpa [#allocation4], 1 }
 0x5d1   :  { %1266 = vsyncpa [#allocation4 + $0x1], 1 }
 0x5d2   :  { %1267 = vsyncpa [#allocation5], 1 }
 0x5d3   :  { %1269 = vsyncpa [#allocation5 + $0x1], 1 }

</bundles_post_ra>
